<compile_context>
chip_gen: v5e
topology: v5e:2x2
jax: 0.10.0
libtpu: 0.0.40
codegen_flags: <defaults>
</compile_context>

<pallas_src>
import jax
import jax.numpy as jnp
from jax.experimental import pallas as pl
from jax.experimental.pallas import tpu as pltpu


def _spade2_kernel(x_ref, gamma_ref, beta_ref, o_ref):
    # x_ref/o_ref: (nb, tm, W); gamma_ref/beta_ref: (1, tm, W).
    # Broadcast over the leading batch axis; one fused multiply-add statement,
    # no scratch temporaries materialized in VMEM.
    o_ref[...] = x_ref[...] * (1.0 + gamma_ref[...]) + beta_ref[...]


def _round_up(v, m):
    return -(-v // m) * m


def _vmem_budget_and_limit():
    """Generation-aware VMEM budget for the double-buffered working set."""
    try:
        cap = int(pltpu.get_tpu_info().vmem_capacity_bytes)
    except Exception:
        cap = 64 << 20  # conservative fallback: smallest per-core VMEM (v7x)
    budget = min(cap // 2, 40 << 20)                  # user tiles, double-buffered
    limit = min((cap * 3) // 4, budget + (16 << 20))  # scoped limit with headroom
    return budget, limit


def _pick_tiles(N, M, W, itemsize, vmem_budget):
    """Pick (batch_block, middle_block) for arrays viewed as (N, M, W)."""

    def footprint(nb, tm):
        # Double-buffered: x + out tiles (nb rows each) + gamma + beta tiles.
        return 2 * (2 * nb + 2) * tm * W * itemsize

    # Sublane-legal granule for the middle (second-to-last) axis.
    m_step = 8 if M % 8 == 0 else M

    # Preferred: whole batch per block; largest middle tile within budget,
    # aiming for >= 2 grid steps (one block per v7x TensorCore).
    max_tm = (vmem_budget // footprint(N, 1) // m_step) * m_step
    if max_tm >= m_step:
        target_steps = 2 if M > m_step else 1
        tm = min(max_tm, _round_up(-(-M // target_steps), m_step), M)
        return N, tm

    # Fallback for huge batch / spatial: also tile the batch (params are then
    # re-fetched once per batch block, acceptable in this regime).
    tm = m_step
    nb = (vmem_budget // (2 * tm * W * itemsize) - 2) // 2
    nb = int(max(1, min(nb, N)))
    # TODO(synk): if even a (1, m_step, W) tile overflows VMEM (astronomically
    # large W), a lane-axis split would be needed; not relevant for this module.
    return nb, tm


def spade2_forward(x, gamma, beta):
    """out = x * (1 + gamma) + beta, broadcasting gamma/beta over batch.

    x:     (N, C, H, W)  float32
    gamma: (1, C, H, W)  float32
    beta:  (1, C, H, W)  float32
    """
    N, C, H, W = x.shape
    assert gamma.shape == (1, C, H, W)
    assert beta.shape == (1, C, H, W)

    # Collapse C and H: contiguous (free) reshape; keeps W lane-dense last.
    M = C * H
    x3 = x.reshape(N, M, W)
    g3 = gamma.reshape(1, M, W)
    b3 = beta.reshape(1, M, W)

    budget, vmem_limit = _vmem_budget_and_limit()
    nb, tm = _pick_tiles(N, M, W, x.dtype.itemsize, budget)

    grid = (pl.cdiv(N, nb), pl.cdiv(M, tm))
    x_spec = pl.BlockSpec((nb, tm, W), lambda n, m: (n, m, 0))
    p_spec = pl.BlockSpec((1, tm, W), lambda n, m: (0, m, 0))

    out3 = pl.pallas_call(
        _spade2_kernel,
        out_shape=jax.ShapeDtypeStruct((N, M, W), x.dtype),
        grid_spec=pltpu.PrefetchScalarGridSpec(
            num_scalar_prefetch=0,
            grid=grid,
            in_specs=[x_spec, p_spec, p_spec],
            out_specs=x_spec,
        ),
        compiler_params=pltpu.CompilerParams(
            dimension_semantics=("parallel", "parallel"),
            vmem_limit_bytes=int(vmem_limit),
        ),
    )(x3, g3, b3)

    return out3.reshape(N, C, H, W)


if __name__ == "__main__":
    # Module constructor fixes gamma/beta at (1, nc_in, 256, 256), so x must be
    # 256x256 spatially for the broadcast in forward() to be valid.
    N = 2
    NC_IN = 4
    H = W = 256

    key = jax.random.PRNGKey(0)
    kx, kg, kb = jax.random.split(key, 3)

    x = jax.random.normal(kx, (N, NC_IN, H, W), dtype=jnp.float32)
    # Deterministic stand-ins for torch.randn(1, nc_in, 256, 256) parameters.
    gamma = jax.random.normal(kg, (1, NC_IN, H, W), dtype=jnp.float32)
    beta = jax.random.normal(kb, (1, NC_IN, H, W), dtype=jnp.float32)

    out = jax.block_until_ready(spade2_forward(x, gamma, beta))

    # Reference check in plain JAX (matches the PyTorch forward semantics).
    ref = x * (1.0 + gamma) + beta
    assert out.shape == (N, NC_IN, H, W)
    assert jnp.allclose(out, ref, atol=1e-6, rtol=1e-6)

    # TODO(synk): InstanceNorm2d / mlp_shared / mlp_gamma / mlp_beta are defined
    # in __init__ but unused in forward(), so they are not implemented.

    print("KERNEL_OK")
</pallas_src>

<mosaic_0001>
module attributes {stable_mosaic.version = 11 : i64} {
  func.func @_spade2_kernel(%arg0: i32, %arg1: i32, %arg2: memref<2x512x256xf32, #tpu.memory_space<vmem>>, %arg3: memref<1x512x256xf32, #tpu.memory_space<vmem>>, %arg4: memref<1x512x256xf32, #tpu.memory_space<vmem>>, %arg5: memref<2x512x256xf32, #tpu.memory_space<vmem>>) attributes {dimension_semantics = [#tpu.dimension_semantics<parallel>, #tpu.dimension_semantics<parallel>], iteration_bounds = array<i64: 1, 2>, scalar_prefetch = 0 : i64, scratch_operands = 0 : i64, tpu.core_type = #tpu.core_type<tc>, window_params = [{transform_indices = @transform_0, window_bounds = array<i64: 2, 512, 256>}, {transform_indices = @transform_1, window_bounds = array<i64: 1, 512, 256>}, {transform_indices = @transform_2, window_bounds = array<i64: 1, 512, 256>}, {transform_indices = @transform_3, window_bounds = array<i64: 2, 512, 256>}]} {
    %c0 = arith.constant 0 : index
    %c0_0 = arith.constant 0 : index
    %c0_1 = arith.constant 0 : index
    %0 = vector.load %arg2[%c0, %c0_0, %c0_1] : memref<2x512x256xf32, #tpu.memory_space<vmem>>, vector<2x512x256xf32>
    %c0_2 = arith.constant 0 : index
    %c0_3 = arith.constant 0 : index
    %c0_4 = arith.constant 0 : index
    %1 = vector.load %arg3[%c0_2, %c0_3, %c0_4] : memref<1x512x256xf32, #tpu.memory_space<vmem>>, vector<1x512x256xf32>
    %cst = arith.constant 1.000000e+00 : f32
    %2 = vector.broadcast %cst : f32 to vector<1x512x256xf32>
    %3 = arith.addf %2, %1 : vector<1x512x256xf32>
    %4 = vector.broadcast %3 : vector<1x512x256xf32> to vector<2x512x256xf32>
    %5 = arith.mulf %0, %4 : vector<2x512x256xf32>
    %c0_5 = arith.constant 0 : index
    %c0_6 = arith.constant 0 : index
    %c0_7 = arith.constant 0 : index
    %6 = vector.load %arg4[%c0_5, %c0_6, %c0_7] : memref<1x512x256xf32, #tpu.memory_space<vmem>>, vector<1x512x256xf32>
    %7 = vector.broadcast %6 : vector<1x512x256xf32> to vector<2x512x256xf32>
    %8 = arith.addf %5, %7 : vector<2x512x256xf32>
    %c0_8 = arith.constant 0 : index
    %c0_9 = arith.constant 0 : index
    %c0_10 = arith.constant 0 : index
    %9 = vector.load %arg5[%c0_8, %c0_9, %c0_10] : memref<2x512x256xf32, #tpu.memory_space<vmem>>, vector<2x512x256xf32>
    tpu.vector_store %arg5[%c0_8, %c0_9, %c0_10], %8 {strides = array<i32>} : memref<2x512x256xf32, #tpu.memory_space<vmem>>, vector<2x512x256xf32>,
    return
  }
  func.func @transform_0(%arg0: i32, %arg1: i32) -> (i32, i32, i32) {
    %c0_i32 = arith.constant 0 : i32
    %c0_i32_0 = arith.constant 0 : i32
    return %arg0, %arg1, %c0_i32 : i32, i32, i32
  }
  func.func @transform_1(%arg0: i32, %arg1: i32) -> (i32, i32, i32) {
    %c0_i32 = arith.constant 0 : i32
    %c0_i32_0 = arith.constant 0 : i32
    %c0_i32_1 = arith.constant 0 : i32
    return %c0_i32, %arg1, %c0_i32_0 : i32, i32, i32
  }
  func.func @transform_2(%arg0: i32, %arg1: i32) -> (i32, i32, i32) {
    %c0_i32 = arith.constant 0 : i32
    %c0_i32_0 = arith.constant 0 : i32
    %c0_i32_1 = arith.constant 0 : i32
    return %c0_i32, %arg1, %c0_i32_0 : i32, i32, i32
  }
  func.func @transform_3(%arg0: i32, %arg1: i32) -> (i32, i32, i32) {
    %c0_i32 = arith.constant 0 : i32
    %c0_i32_0 = arith.constant 0 : i32
    return %arg0, %arg1, %c0_i32 : i32, i32, i32
  }
}

</mosaic_0001>

<bundles_post_ra>
// kernel: tpu_custom_call.1
= control target key start
LH: loop header
LB: loop body
LE: loop exit
PB: predicated region body
PF: predicated region fallthrough
CT: control target
= control target key end

     0   :  { %s3902_s0 = inlined_call_operand.hbm [shape: f32[2,1024,256], index: 0, kind: input, shape index: {}]   ;;  %s3903_s1 = inlined_call_operand.hbm [shape: f32[1,1024,256], index: 1, kind: input, shape index: {}]   ;;  %s3904_s2 = inlined_call_operand.hbm [shape: f32[1,1024,256], index: 2, kind: input, shape index: {}]   ;;  %s3905_s3 = inlined_call_operand.hbm [shape: f32[2,1024,256], index: 3, kind: output, shape index: {}]  }
   0x1   :  { %3994 = sst [smem:[#allocation106_spill]] %s3902_s0 }
   0x2   :  { %8 = vsyncpa [#allocation3], 0 }
   0x3   :  { %10 = vsyncpa [#allocation3 + $0x1], 0 }
   0x4   :  { %11 = vsyncpa [#allocation6], 0 }
   0x5   :  { %13 = vsyncpa [#allocation6 + $0x1], 0 }
   0x6   :  { %14 = vsyncpa [#allocation4], 0 }
   0x7   :  { %16 = vsyncpa [#allocation4 + $0x1], 0  ;;  %s2311_s12 = smov 0   ;;  %s2313_s13 = smov 0  }
   0x8   :  { %s2315_s14 = smov 0   ;;  %s2317_s15 = smov 0  }
   0x9   :  { %s2319_s16 = smov 0   ;;  %s2321_s17 = smov 0  }
   0xa LB: > { %3995 = sst [smem:[#allocation17_spill]] %s2270_s16  ;;  %s2342_s18 = sadd.s32 4294967295, %s2274_s17   ;;  %s2274_s17 = sphi %s2321_s17, %s22_s17   ;;  %s2270_s16 = sphi %s2319_s16, %s4181_s16   ;;  %s2266_s15 = sphi %s2317_s15, %s4176_s15   ;;  %s2262_s14 = sphi %s2315_s14, %s4180_s14   ;;  %s2258_s13 = sphi %s2313_s13, %s4179_s13   ;;  %s2254_s12 = sphi %s2311_s12, %s4178_s12  }
   0xb   : > { %s1907_s19 = sadd.s32 4294967294, %s2274_s17   ;;  %s31_s20 = sadd.s32 1, %s2270_s16 }
   0xc   : > { %s43_s21 = sadd.s32 1, %s2262_s14  ;;  %p32_p0 = scmp.ge.s32.totalorder %s31_s20, 2 }
   0xd   : > { %p50_p1 = scmp.ne.s32.totalorder %s2262_s14, %s2258_s13  ;;  %p51_p2 = scmp.eq.s32.totalorder %s2274_s17, 0 }
   0xe   : > { %p56_p3 = scmp.ne.s32.totalorder %s2258_s13, %s2254_s12  ;;  %s4183_s20 = smov (%p32_p0, %s31_s20), 0 }
   0xf   : > { %3996 = sst [smem:[#allocation18_spill]] %s4183_s20  ;;  %p2354_p4 = por %p51_p2, %p50_p1 }
  0x10   : > { %p57_p5 = scmp.eq.s32.totalorder %s2342_s18, 0  ;;  %s39_s23 = ssub.s32 %s2270_s16, %s4183_s20 }
  0x11   : > { %p134_p6 = scmp.eq.s32.totalorder %s2342_s18, 1  ;;  %p41_p7 = scmp.eq.s32.totalorder %s39_s23, 0 }
  0x12   : > { %p2362_p8 = por %p57_p5, %p56_p3  ;;  %p140_p10 = scmp.eq.s32.totalorder %s1907_s19, 1 }
  0x13   : > { %p2366_p9 = por %p134_p6, %p50_p1  ;;  %p1909_p12 = scmp.ge.s32.totalorder %s2274_s17, 2 }
  0x14   : > { %s2371_s26 = scalar_select %p41_p7, %s2262_s14, %s43_s21  }
  0x15   : > { %p2373_p11 = por %p140_p10, %p56_p3  ;;  %156 = sbr.rel (%p1909_p12) target bundleno = 49 (0x31), region = 16 }
  0x16   : > { %4000 = sst [smem:[#allocation19_spill]] %s2371_s26 }
  0x1a   : > { %s2381_s28 = sand.u32 1, %s2262_s14   ;;  %s2384_s29 = sshll.u32 %s2270_s16, 10 }
  0x1b   : > { %s1910_s30 = sshll.u32 %s2381_s28, 11  ;;  %s4002_s0 = sld [smem:[#allocation106_spill]] }
  0x1c   : > { %s1943_s7 = scalar_select %p2354_p4, [#allocation0], [#allocation13] }
  0x1d   : > { %s164_s9 = scalar_lea.vmem [#allocation2], %s1910_s30  ;;  %s2276_s19 = smov 32768  }
  0x1e   : > { %s188_s10 = sshll.u32 %s164_s9, 4  ;;  %s178_s11 = sld [smem:[%s1943_s7]]   ;;  %s189_s10 = int_to_ptr.vmem [resolvable:$true] %s188_s10 }
  0x1f   : > { %1944 = sst [smem:[#allocation10]] (%p2354_p4), %s2276_s19  ;;  %s2277_s21 = smov 16384  }
  0x20   : > { %1945 = sst [smem:[#allocation10 + $0x1]] (%p2354_p4), %s2277_s21  ;;  %s2278_s23 = smov 64  }
  0x21   : > { %s173_s6 = scalar_lea.hbm %s4002_s0, %s2384_s29  ;;  %1946 = sst [smem:[#allocation10 + $0x2]] (%p2354_p4), %s2278_s23 }
  0x22   : > { %s186_s8 = sshll.u32 %s173_s6, 4  ;;  %s2279_s4 = smov 256   ;;  %s187_s8 = int_to_ptr.hbm [resolvable:$true] %s186_s8 }
  0x23   : > { %1947 = sst [smem:[#allocation10 + $0x3]] (%p2354_p4), %s2279_s4  ;;  %s2280_s6 = smov 16  }
  0x24   : > { %s1914_s30 = sshll.u32 %s178_s11, 26  ;;  %1948 = sst [smem:[#allocation10 + $0x4]] (%p2354_p4), %s2279_s4 }
  0x25   : > { %s1915_s5 = sadd.s32 134217728, %s1914_s30  ;;  %1949 = sst [smem:[#allocation10 + $0x5]] (%p2354_p4), %s2280_s6 }
  0x26   : > { %s161_s7 = scalar_lea.sflag [#allocation3], %s2381_s28  ;;  %s2281_s9 = smov [#allocation9]  }
  0x27   : > { %1950 = dma.general (%p2354_p4), %s187_s8, 32768, %s189_s10, %s161_s7, %s2281_s9, [#allocation10], %s1915_s5, 0  }
  0x28   : > { %s211_s19 = sand.u32 1, %s2274_s17   ;;  %s1916_s21 = sshll.u32 %s2381_s28, 10 }
  0x29   : > { %s221_s11 = scalar_lea.hbm %s3903_s1, %s2384_s29  ;;  %s215_s4 = scalar_lea.vmem [#allocation5], %s1916_s21 }
  0x2a   : > { %s224_s30 = sshll.u32 %s215_s4, 4  ;;  %s222_s20 = sshll.u32 %s221_s11, 4  ;;  %s225_s30 = int_to_ptr.vmem [resolvable:$true] %s224_s30  ;;  %s223_s20 = int_to_ptr.hbm [resolvable:$true] %s222_s20 }
  0x2b   : > { %s212_s6 = scalar_lea.sflag [#allocation6], %s211_s19  ;;  %s2282_s16 = smov 256  }
  0x2c   : > { %s2283_s8 = smov 16   ;;  %s238_s10 = scalar_lea.vmem [#allocation7], %s1916_s21 }
  0x2d   : > { %1951 = dma.hbm_to_vmem [thread:$0]  (%p2354_p4), %s223_s20, 16384, %s225_s30, %s212_s6, %s2282_s16, %s2282_s16, %s2283_s8  }
  0x2e   : > { %s247_s5 = sshll.u32 %s238_s10, 4  ;;  %s244_s28 = scalar_lea.hbm %s3904_s2, %s2384_s29  ;;  %s248_s5 = int_to_ptr.vmem [resolvable:$true] %s247_s5 }
  0x2f   : > { %s245_s26 = sshll.u32 %s244_s28, 4  ;;  %s246_s26 = int_to_ptr.hbm [resolvable:$true] %s245_s26 }
  0x30   : > { %1952 = dma.hbm_to_vmem [thread:$0]  (%p2354_p4), %s246_s26, 16384, %s248_s5, %s212_s6, %s2282_s16, %s2282_s16, %s2283_s8  }
  0x31 PF: > { %p1924_p13 = scmp.ge.s32.totalorder %s2274_s17, 1  ;;  %p255_p0 = scmp.lt.s32.totalorder %s2274_s17, 3 }
  0x33   : > { %p256_p1 = pnand %p1924_p13, %p255_p0 }
  0x35   : > { %259 = sbr.rel (%p256_p1) target bundleno = 425 (0x1a9), region = 32 }
  0x3a   : > { %s2425_s0 = sand.u32 1, %s2258_s13  }
  0x3b   : > { %s1925_s20 = sshll.u32 %s2425_s0, 11  ;;  %s262_s29 = scalar_lea.sflag [#allocation3], %s2425_s0 }
  0x3c   : > { %s2431_s19 = scalar_lea.vmem [#allocation2], %s1925_s20 }
  0x3d   : > { %2241 = dma.done.wait (%p2362_p8), %s262_s29, 32768  }
  0x3e   : > { %2243 = vsyncadd (%p2362_p8), %s262_s29, 4294934528  ;;  %s271_s16 = sand.u32 1, %s2342_s18   ;;  %s1926_s22 = sshll.u32 %s2425_s0, 10 }
  0x3f   : > { %s272_s26 = scalar_lea.sflag [#allocation6], %s271_s16  ;;  %s2439_s21 = scalar_lea.vmem [#allocation5], %s1926_s22 }
  0x40   : > { %2245 = dma.done.wait (%p2362_p8), %s272_s26, 32768  }
  0x41   : > { %2247 = vsyncadd (%p2362_p8), %s272_s26, 4294934528  ;;  %v325_v0 = vld [vmem:[%s2431_s19] sm:$0xff]  ;;  %s2447_s18 = scalar_lea.vmem [#allocation7], %s1926_s22  ;;  %v326_v4 = vld [vmem:[%s2431_s19 + $0x8] sm:$0xff]  ;;  %s2486_s24 = scalar_lea.vmem [#allocation8], %s1925_s20 }
  0x42   : > { %v581_v1 = vld [vmem:[%s2439_s21] sm:$0xff]  ;;  %v582_v5 = vld [vmem:[%s2439_s21 + $0x8] sm:$0xff]  ;;  %v327_v8 = vld [vmem:[%s2431_s19 + $0x10] sm:$0xff]  ;;  %s1734_s23 = scalar_lea.sflag [#allocation4], %s2425_s0 }
  0x43   : > { %v1093_v2 = vld [vmem:[%s2447_s18] sm:$0xff]  ;;  %v2450_v3 = vadd.f32 1.0, %v581_v1  ;;  %v1094_v6 = vld [vmem:[%s2447_s18 + $0x8] sm:$0xff]  ;;  %v2455_v7 = vadd.f32 1.0, %v582_v5  ;;  %v583_v9 = vld [vmem:[%s2439_s21 + $0x10] sm:$0xff] }
  0x44   : > { %v1095_v10 = vld [vmem:[%s2447_s18 + $0x10] sm:$0xff]  ;;  %v2461_v12 = vadd.f32 1.0, %v583_v9  ;;  %v328_v13 = vld [vmem:[%s2431_s19 + $0x18] sm:$0xff]  ;;  %v329_v18 = vld [vmem:[%s2431_s19 + $0x20] sm:$0xff] }
  0x45   : > { %v837_v11 = vmul.f32 %v2450_v3, %v325_v0  ;;  %v584_v14 = vld [vmem:[%s2439_s21 + $0x18] sm:$0xff]  ;;  %v838_v16 = vmul.f32 %v2455_v7, %v326_v4  ;;  %v585_v19 = vld [vmem:[%s2439_s21 + $0x20] sm:$0xff]  ;;  %v330_v24 = vld [vmem:[%s2431_s19 + $0x28] sm:$0xff] }
  0x46   : > { %v1096_v15 = vld [vmem:[%s2447_s18 + $0x18] sm:$0xff]  ;;  %v2467_v17 = vadd.f32 1.0, %v584_v14  ;;  %v1097_v20 = vld [vmem:[%s2447_s18 + $0x20] sm:$0xff]  ;;  %v839_v22 = vmul.f32 %v2461_v12, %v327_v8  ;;  %v2473_v23 = vadd.f32 1.0, %v585_v19  ;;  %v586_v25 = vld [vmem:[%s2439_s21 + $0x28] sm:$0xff] }
  0x47   : > { %v1221_v21 = vadd.f32 %v1093_v2, %v837_v11  ;;  %v1098_v26 = vld [vmem:[%s2447_s18 + $0x28] sm:$0xff]  ;;  %v1222_v27 = vadd.f32 %v1094_v6, %v838_v16  ;;  %v2479_v29 = vadd.f32 1.0, %v586_v25  ;;  %v331_v30 = vld [vmem:[%s2431_s19 + $0x30] sm:$0xff]  ;;  %v332_v36 = vld [vmem:[%s2431_s19 + $0x38] sm:$0xff] }
  0x48   : > { %v840_v28 = vmul.f32 %v2467_v17, %v328_v13  ;;  %v587_v31 = vld [vmem:[%s2439_s21 + $0x30] sm:$0xff]  ;;  %v1223_v33 = vadd.f32 %v1095_v10, %v839_v22  ;;  %v841_v34 = vmul.f32 %v2473_v23, %v329_v18  ;;  %v588_v37 = vld [vmem:[%s2439_s21 + $0x38] sm:$0xff]  ;;  %v333_v42 = vld [vmem:[%s2431_s19 + $0x40] sm:$0xff] }
  0x49   : > { %v1099_v32 = vld [vmem:[%s2447_s18 + $0x30] sm:$0xff]  ;;  %1477 = vst [vmem:[%s2486_s24] sm:$0xff] %v1221_v21  ;;  %v2490_v35 = vadd.f32 1.0, %v587_v31  ;;  %v1100_v38 = vld [vmem:[%s2447_s18 + $0x38] sm:$0xff]  ;;  %v842_v40 = vmul.f32 %v2479_v29, %v330_v24  ;;  %v2497_v41 = vadd.f32 1.0, %v588_v37  ;;  %v589_v43 = vld [vmem:[%s2439_s21 + $0x40] sm:$0xff] }
  0x4a   : > { %1478 = vst [vmem:[%s2486_s24 + $0x8] sm:$0xff] %v1222_v27  ;;  %v1224_v39 = vadd.f32 %v1096_v15, %v840_v28  ;;  %v1101_v44 = vld [vmem:[%s2447_s18 + $0x40] sm:$0xff]  ;;  %v1225_v45 = vadd.f32 %v1097_v20, %v841_v34  ;;  %v2504_v47 = vadd.f32 1.0, %v589_v43  ;;  %v334_v48 = vld [vmem:[%s2431_s19 + $0x48] sm:$0xff]  ;;  %v335_v54 = vld [vmem:[%s2431_s19 + $0x50] sm:$0xff] }
  0x4b   : > { %1479 = vst [vmem:[%s2486_s24 + $0x10] sm:$0xff] %v1223_v33  ;;  %v843_v46 = vmul.f32 %v2490_v35, %v331_v30  ;;  %v590_v49 = vld [vmem:[%s2439_s21 + $0x48] sm:$0xff]  ;;  %v1226_v51 = vadd.f32 %v1098_v26, %v842_v40  ;;  %v844_v52 = vmul.f32 %v2497_v41, %v332_v36  ;;  %v591_v55 = vld [vmem:[%s2439_s21 + $0x50] sm:$0xff]  ;;  %v336_v60 = vld [vmem:[%s2431_s19 + $0x58] sm:$0xff] }
  0x4c   : > { %v1102_v50 = vld [vmem:[%s2447_s18 + $0x48] sm:$0xff]  ;;  %1480 = vst [vmem:[%s2486_s24 + $0x18] sm:$0xff] %v1224_v39  ;;  %v2511_v53 = vadd.f32 1.0, %v590_v49  ;;  %v1103_v56 = vld [vmem:[%s2447_s18 + $0x50] sm:$0xff]  ;;  %v845_v58 = vmul.f32 %v2504_v47, %v333_v42  ;;  %v2518_v59 = vadd.f32 1.0, %v591_v55  ;;  %v592_v61 = vld [vmem:[%s2439_s21 + $0x58] sm:$0xff] }
  0x4d   : > { %1481 = vst [vmem:[%s2486_s24 + $0x20] sm:$0xff] %v1225_v45  ;;  %v1227_v57 = vadd.f32 %v1099_v32, %v843_v46  ;;  %v1104_v62 = vld [vmem:[%s2447_s18 + $0x58] sm:$0xff]  ;;  %v1228_v63 = vadd.f32 %v1100_v38, %v844_v52  ;;  %v2525_v1 = vadd.f32 1.0, %v592_v61  ;;  %v337_v2 = vld [vmem:[%s2431_s19 + $0x60] sm:$0xff]  ;;  %v338_v10 = vld [vmem:[%s2431_s19 + $0x68] sm:$0xff] }
  0x4e   : > { %1482 = vst [vmem:[%s2486_s24 + $0x28] sm:$0xff] %v1226_v51  ;;  %v846_v0 = vmul.f32 %v2511_v53, %v334_v48  ;;  %v593_v4 = vld [vmem:[%s2439_s21 + $0x60] sm:$0xff]  ;;  %v1229_v6 = vadd.f32 %v1101_v44, %v845_v58  ;;  %v847_v8 = vmul.f32 %v2518_v59, %v335_v54  ;;  %v594_v11 = vld [vmem:[%s2439_s21 + $0x68] sm:$0xff]  ;;  %v339_v18 = vld [vmem:[%s2431_s19 + $0x70] sm:$0xff] }
  0x4f   : > { %v1105_v5 = vld [vmem:[%s2447_s18 + $0x60] sm:$0xff]  ;;  %1483 = vst [vmem:[%s2486_s24 + $0x30] sm:$0xff] %v1227_v57  ;;  %v2532_v9 = vadd.f32 1.0, %v593_v4  ;;  %v1106_v13 = vld [vmem:[%s2447_s18 + $0x68] sm:$0xff]  ;;  %v848_v15 = vmul.f32 %v2525_v1, %v336_v60  ;;  %v2539_v16 = vadd.f32 1.0, %v594_v11  ;;  %v595_v19 = vld [vmem:[%s2439_s21 + $0x70] sm:$0xff] }
  0x50   : > { %1484 = vst [vmem:[%s2486_s24 + $0x38] sm:$0xff] %v1228_v63  ;;  %v1230_v14 = vadd.f32 %v1102_v50, %v846_v0  ;;  %v1107_v20 = vld [vmem:[%s2447_s18 + $0x70] sm:$0xff]  ;;  %v1231_v21 = vadd.f32 %v1103_v56, %v847_v8  ;;  %v2546_v24 = vadd.f32 1.0, %v595_v19  ;;  %v340_v25 = vld [vmem:[%s2431_s19 + $0x78] sm:$0xff]  ;;  %v341_v32 = vld [vmem:[%s2431_s19 + $0x80] sm:$0xff] }
  0x51   : > { %1485 = vst [vmem:[%s2486_s24 + $0x40] sm:$0xff] %v1229_v6  ;;  %v849_v22 = vmul.f32 %v2532_v9, %v337_v2  ;;  %v596_v26 = vld [vmem:[%s2439_s21 + $0x78] sm:$0xff]  ;;  %v1232_v28 = vadd.f32 %v1104_v62, %v848_v15  ;;  %v850_v30 = vmul.f32 %v2539_v16, %v338_v10  ;;  %v597_v33 = vld [vmem:[%s2439_s21 + $0x80] sm:$0xff]  ;;  %v342_v39 = vld [vmem:[%s2431_s19 + $0x88] sm:$0xff] }
  0x52   : > { %v1108_v27 = vld [vmem:[%s2447_s18 + $0x78] sm:$0xff]  ;;  %1486 = vst [vmem:[%s2486_s24 + $0x48] sm:$0xff] %v1230_v14  ;;  %v2553_v31 = vadd.f32 1.0, %v596_v26  ;;  %v1109_v34 = vld [vmem:[%s2447_s18 + $0x80] sm:$0xff]  ;;  %v851_v37 = vmul.f32 %v2546_v24, %v339_v18  ;;  %v2560_v38 = vadd.f32 1.0, %v597_v33  ;;  %v598_v40 = vld [vmem:[%s2439_s21 + $0x88] sm:$0xff] }
  0x53   : > { %1487 = vst [vmem:[%s2486_s24 + $0x50] sm:$0xff] %v1231_v21  ;;  %v1233_v36 = vadd.f32 %v1105_v5, %v849_v22  ;;  %v1110_v42 = vld [vmem:[%s2447_s18 + $0x88] sm:$0xff]  ;;  %v1234_v43 = vadd.f32 %v1106_v13, %v850_v30  ;;  %v2567_v45 = vadd.f32 1.0, %v598_v40  ;;  %v343_v46 = vld [vmem:[%s2431_s19 + $0x90] sm:$0xff]  ;;  %v344_v54 = vld [vmem:[%s2431_s19 + $0x98] sm:$0xff] }
  0x54   : > { %1488 = vst [vmem:[%s2486_s24 + $0x58] sm:$0xff] %v1232_v28  ;;  %v852_v44 = vmul.f32 %v2553_v31, %v340_v25  ;;  %v599_v48 = vld [vmem:[%s2439_s21 + $0x90] sm:$0xff]  ;;  %v1235_v50 = vadd.f32 %v1107_v20, %v851_v37  ;;  %v853_v51 = vmul.f32 %v2560_v38, %v341_v32  ;;  %v600_v55 = vld [vmem:[%s2439_s21 + $0x98] sm:$0xff]  ;;  %v345_v61 = vld [vmem:[%s2431_s19 + $0xa0] sm:$0xff] }
  0x55   : > { %v1111_v49 = vld [vmem:[%s2447_s18 + $0x90] sm:$0xff]  ;;  %1489 = vst [vmem:[%s2486_s24 + $0x60] sm:$0xff] %v1233_v36  ;;  %v2574_v52 = vadd.f32 1.0, %v599_v48  ;;  %v1112_v56 = vld [vmem:[%s2447_s18 + $0x98] sm:$0xff]  ;;  %v854_v58 = vmul.f32 %v2567_v45, %v342_v39  ;;  %v2581_v60 = vadd.f32 1.0, %v600_v55  ;;  %v601_v62 = vld [vmem:[%s2439_s21 + $0xa0] sm:$0xff] }
  0x56   : > { %1490 = vst [vmem:[%s2486_s24 + $0x68] sm:$0xff] %v1234_v43  ;;  %v1236_v57 = vadd.f32 %v1108_v27, %v852_v44  ;;  %v1113_v63 = vld [vmem:[%s2447_s18 + $0xa0] sm:$0xff]  ;;  %v1237_v0 = vadd.f32 %v1109_v34, %v853_v51  ;;  %v2588_v4 = vadd.f32 1.0, %v601_v62  ;;  %v346_v5 = vld [vmem:[%s2431_s19 + $0xa8] sm:$0xff]  ;;  %v347_v14 = vld [vmem:[%s2431_s19 + $0xb0] sm:$0xff] }
  0x57   : > { %1491 = vst [vmem:[%s2486_s24 + $0x70] sm:$0xff] %v1235_v50  ;;  %v855_v2 = vmul.f32 %v2574_v52, %v343_v46  ;;  %v602_v6 = vld [vmem:[%s2439_s21 + $0xa8] sm:$0xff]  ;;  %v1238_v10 = vadd.f32 %v1110_v42, %v854_v58  ;;  %v856_v11 = vmul.f32 %v2581_v60, %v344_v54  ;;  %v603_v15 = vld [vmem:[%s2439_s21 + $0xb0] sm:$0xff]  ;;  %v348_v22 = vld [vmem:[%s2431_s19 + $0xb8] sm:$0xff] }
  0x58   : > { %v1114_v8 = vld [vmem:[%s2447_s18 + $0xa8] sm:$0xff]  ;;  %1492 = vst [vmem:[%s2486_s24 + $0x78] sm:$0xff] %v1236_v57  ;;  %v2595_v13 = vadd.f32 1.0, %v602_v6  ;;  %v1115_v18 = vld [vmem:[%s2447_s18 + $0xb0] sm:$0xff]  ;;  %v857_v20 = vmul.f32 %v2588_v4, %v345_v61  ;;  %v2602_v21 = vadd.f32 1.0, %v603_v15  ;;  %v604_v25 = vld [vmem:[%s2439_s21 + $0xb8] sm:$0xff] }
  0x59   : > { %1493 = vst [vmem:[%s2486_s24 + $0x80] sm:$0xff] %v1237_v0  ;;  %v1239_v19 = vadd.f32 %v1111_v49, %v855_v2  ;;  %v1116_v26 = vld [vmem:[%s2447_s18 + $0xb8] sm:$0xff]  ;;  %v1240_v27 = vadd.f32 %v1112_v56, %v856_v11  ;;  %v2609_v30 = vadd.f32 1.0, %v604_v25  ;;  %v349_v32 = vld [vmem:[%s2431_s19 + $0xc0] sm:$0xff]  ;;  %v350_v40 = vld [vmem:[%s2431_s19 + $0xc8] sm:$0xff] }
  0x5a   : > { %1494 = vst [vmem:[%s2486_s24 + $0x88] sm:$0xff] %v1238_v10  ;;  %v858_v28 = vmul.f32 %v2595_v13, %v346_v5  ;;  %v605_v33 = vld [vmem:[%s2439_s21 + $0xc0] sm:$0xff]  ;;  %v1241_v36 = vadd.f32 %v1113_v63, %v857_v20  ;;  %v859_v37 = vmul.f32 %v2602_v21, %v347_v14  ;;  %v606_v42 = vld [vmem:[%s2439_s21 + $0xc8] sm:$0xff]  ;;  %v351_v49 = vld [vmem:[%s2431_s19 + $0xd0] sm:$0xff] }
  0x5b   : > { %v1117_v34 = vld [vmem:[%s2447_s18 + $0xc0] sm:$0xff]  ;;  %1495 = vst [vmem:[%s2486_s24 + $0x90] sm:$0xff] %v1239_v19  ;;  %v2616_v39 = vadd.f32 1.0, %v605_v33  ;;  %v1118_v43 = vld [vmem:[%s2447_s18 + $0xc8] sm:$0xff]  ;;  %v860_v46 = vmul.f32 %v2609_v30, %v348_v22  ;;  %v2623_v48 = vadd.f32 1.0, %v606_v42  ;;  %v607_v50 = vld [vmem:[%s2439_s21 + $0xd0] sm:$0xff] }
  0x5c   : > { %1496 = vst [vmem:[%s2486_s24 + $0x98] sm:$0xff] %v1240_v27  ;;  %v1242_v44 = vadd.f32 %v1114_v8, %v858_v28  ;;  %v1119_v51 = vld [vmem:[%s2447_s18 + $0xd0] sm:$0xff]  ;;  %v1243_v54 = vadd.f32 %v1115_v18, %v859_v37  ;;  %v2630_v56 = vadd.f32 1.0, %v607_v50  ;;  %v352_v57 = vld [vmem:[%s2431_s19 + $0xd8] sm:$0xff]  ;;  %v353_v2 = vld [vmem:[%s2431_s19 + $0xe0] sm:$0xff] }
  0x5d   : > { %1497 = vst [vmem:[%s2486_s24 + $0xa0] sm:$0xff] %v1241_v36  ;;  %v861_v55 = vmul.f32 %v2616_v39, %v349_v32  ;;  %v608_v58 = vld [vmem:[%s2439_s21 + $0xd8] sm:$0xff]  ;;  %v1244_v62 = vadd.f32 %v1116_v26, %v860_v46  ;;  %v862_v63 = vmul.f32 %v2623_v48, %v350_v40  ;;  %v609_v5 = vld [vmem:[%s2439_s21 + $0xe0] sm:$0xff]  ;;  %v354_v14 = vld [vmem:[%s2431_s19 + $0xe8] sm:$0xff] }
  0x5e   : > { %v1120_v61 = vld [vmem:[%s2447_s18 + $0xd8] sm:$0xff]  ;;  %1498 = vst [vmem:[%s2486_s24 + $0xa8] sm:$0xff] %v1242_v44  ;;  %v2637_v0 = vadd.f32 1.0, %v608_v58  ;;  %v1121_v6 = vld [vmem:[%s2447_s18 + $0xe0] sm:$0xff]  ;;  %v863_v10 = vmul.f32 %v2630_v56, %v351_v49  ;;  %v2644_v11 = vadd.f32 1.0, %v609_v5  ;;  %v610_v15 = vld [vmem:[%s2439_s21 + $0xe8] sm:$0xff] }
  0x5f   : > { %1499 = vst [vmem:[%s2486_s24 + $0xb0] sm:$0xff] %v1243_v54  ;;  %v1245_v8 = vadd.f32 %v1117_v34, %v861_v55  ;;  %v1122_v18 = vld [vmem:[%s2447_s18 + $0xe8] sm:$0xff]  ;;  %v1246_v19 = vadd.f32 %v1118_v43, %v862_v63  ;;  %v2651_v22 = vadd.f32 1.0, %v610_v15  ;;  %v355_v25 = vld [vmem:[%s2431_s19 + $0xf0] sm:$0xff]  ;;  %v356_v34 = vld [vmem:[%s2431_s19 + $0xf8] sm:$0xff] }
  0x60   : > { %1500 = vst [vmem:[%s2486_s24 + $0xb8] sm:$0xff] %v1244_v62  ;;  %v864_v20 = vmul.f32 %v2637_v0, %v352_v57  ;;  %v611_v26 = vld [vmem:[%s2439_s21 + $0xf0] sm:$0xff]  ;;  %v1247_v28 = vadd.f32 %v1119_v51, %v863_v10  ;;  %v865_v32 = vmul.f32 %v2644_v11, %v353_v2  ;;  %v612_v36 = vld [vmem:[%s2439_s21 + $0xf8] sm:$0xff]  ;;  %v357_v44 = vld [vmem:[%s2431_s19 + $0x100] sm:$0xff] }
  0x61   : > { %v1123_v27 = vld [vmem:[%s2447_s18 + $0xf0] sm:$0xff]  ;;  %1501 = vst [vmem:[%s2486_s24 + $0xc0] sm:$0xff] %v1245_v8  ;;  %v2658_v33 = vadd.f32 1.0, %v611_v26  ;;  %v1124_v37 = vld [vmem:[%s2447_s18 + $0xf8] sm:$0xff]  ;;  %v866_v42 = vmul.f32 %v2651_v22, %v354_v14  ;;  %v2665_v43 = vadd.f32 1.0, %v612_v36  ;;  %v613_v46 = vld [vmem:[%s2439_s21 + $0x100] sm:$0xff] }
  0x62   : > { %1502 = vst [vmem:[%s2486_s24 + $0xc8] sm:$0xff] %v1246_v19  ;;  %v1248_v40 = vadd.f32 %v1120_v61, %v864_v20  ;;  %v1125_v49 = vld [vmem:[%s2447_s18 + $0x100] sm:$0xff]  ;;  %v1249_v50 = vadd.f32 %v1121_v6, %v865_v32  ;;  %v2672_v54 = vadd.f32 1.0, %v613_v46  ;;  %v358_v55 = vld [vmem:[%s2431_s19 + $0x108] sm:$0xff]  ;;  %v359_v2 = vld [vmem:[%s2431_s19 + $0x110] sm:$0xff] }
  0x63   : > { %1503 = vst [vmem:[%s2486_s24 + $0xd0] sm:$0xff] %v1247_v28  ;;  %v867_v51 = vmul.f32 %v2658_v33, %v355_v25  ;;  %v614_v57 = vld [vmem:[%s2439_s21 + $0x108] sm:$0xff]  ;;  %v1250_v61 = vadd.f32 %v1122_v18, %v866_v42  ;;  %v868_v62 = vmul.f32 %v2665_v43, %v356_v34  ;;  %v615_v5 = vld [vmem:[%s2439_s21 + $0x110] sm:$0xff]  ;;  %v360_v15 = vld [vmem:[%s2431_s19 + $0x118] sm:$0xff] }
  0x64   : > { %v1126_v58 = vld [vmem:[%s2447_s18 + $0x108] sm:$0xff]  ;;  %1504 = vst [vmem:[%s2486_s24 + $0xd8] sm:$0xff] %v1248_v40  ;;  %v2679_v63 = vadd.f32 1.0, %v614_v57  ;;  %v1127_v6 = vld [vmem:[%s2447_s18 + $0x110] sm:$0xff]  ;;  %v869_v10 = vmul.f32 %v2672_v54, %v357_v44  ;;  %v2686_v14 = vadd.f32 1.0, %v615_v5  ;;  %v616_v18 = vld [vmem:[%s2439_s21 + $0x118] sm:$0xff] }
  0x65   : > { %1505 = vst [vmem:[%s2486_s24 + $0xe0] sm:$0xff] %v1249_v50  ;;  %v1251_v8 = vadd.f32 %v1123_v27, %v867_v51  ;;  %v1128_v19 = vld [vmem:[%s2447_s18 + $0x118] sm:$0xff]  ;;  %v1252_v20 = vadd.f32 %v1124_v37, %v868_v62  ;;  %v2693_v26 = vadd.f32 1.0, %v616_v18  ;;  %v361_v27 = vld [vmem:[%s2431_s19 + $0x120] sm:$0xff]  ;;  %v362_v37 = vld [vmem:[%s2431_s19 + $0x128] sm:$0xff] }
  0x66   : > { %1506 = vst [vmem:[%s2486_s24 + $0xe8] sm:$0xff] %v1250_v61  ;;  %v870_v25 = vmul.f32 %v2679_v63, %v358_v55  ;;  %v617_v28 = vld [vmem:[%s2439_s21 + $0x120] sm:$0xff]  ;;  %v1253_v34 = vadd.f32 %v1125_v49, %v869_v10  ;;  %v871_v36 = vmul.f32 %v2686_v14, %v359_v2  ;;  %v618_v42 = vld [vmem:[%s2439_s21 + $0x128] sm:$0xff]  ;;  %v363_v49 = vld [vmem:[%s2431_s19 + $0x130] sm:$0xff] }
  0x67   : > { %v1129_v32 = vld [vmem:[%s2447_s18 + $0x120] sm:$0xff]  ;;  %1507 = vst [vmem:[%s2486_s24 + $0xf0] sm:$0xff] %v1251_v8  ;;  %v2700_v40 = vadd.f32 1.0, %v617_v28  ;;  %v1130_v44 = vld [vmem:[%s2447_s18 + $0x128] sm:$0xff]  ;;  %v872_v50 = vmul.f32 %v2693_v26, %v360_v15  ;;  %v2707_v51 = vadd.f32 1.0, %v618_v42  ;;  %v619_v55 = vld [vmem:[%s2439_s21 + $0x130] sm:$0xff] }
  0x68   : > { %1508 = vst [vmem:[%s2486_s24 + $0xf8] sm:$0xff] %v1252_v20  ;;  %v1254_v46 = vadd.f32 %v1126_v58, %v870_v25  ;;  %v1131_v57 = vld [vmem:[%s2447_s18 + $0x130] sm:$0xff]  ;;  %v1255_v61 = vadd.f32 %v1127_v6, %v871_v36  ;;  %v2714_v2 = vadd.f32 1.0, %v619_v55  ;;  %v364_v58 = vld [vmem:[%s2431_s19 + $0x138] sm:$0xff]  ;;  %v365_v6 = vld [vmem:[%s2431_s19 + $0x140] sm:$0xff] }
  0x69   : > { %1509 = vst [vmem:[%s2486_s24 + $0x100] sm:$0xff] %v1253_v34  ;;  %v873_v62 = vmul.f32 %v2700_v40, %v361_v27  ;;  %v620_v5 = vld [vmem:[%s2439_s21 + $0x138] sm:$0xff]  ;;  %v1256_v10 = vadd.f32 %v1128_v19, %v872_v50  ;;  %v874_v15 = vmul.f32 %v2707_v51, %v362_v37  ;;  %v621_v20 = vld [vmem:[%s2439_s21 + $0x140] sm:$0xff]  ;;  %v366_v19 = vld [vmem:[%s2431_s19 + $0x148] sm:$0xff] }
  0x6a   : > { %v1132_v8 = vld [vmem:[%s2447_s18 + $0x138] sm:$0xff]  ;;  %1510 = vst [vmem:[%s2486_s24 + $0x108] sm:$0xff] %v1254_v46  ;;  %v2721_v18 = vadd.f32 1.0, %v620_v5  ;;  %v1133_v25 = vld [vmem:[%s2447_s18 + $0x140] sm:$0xff]  ;;  %v875_v28 = vmul.f32 %v2714_v2, %v363_v49  ;;  %v2728_v34 = vadd.f32 1.0, %v621_v20  ;;  %v622_v36 = vld [vmem:[%s2439_s21 + $0x148] sm:$0xff] }
  0x6b   : > { %1511 = vst [vmem:[%s2486_s24 + $0x110] sm:$0xff] %v1255_v61  ;;  %v1257_v27 = vadd.f32 %v1129_v32, %v873_v62  ;;  %v1134_v37 = vld [vmem:[%s2447_s18 + $0x148] sm:$0xff]  ;;  %v1258_v42 = vadd.f32 %v1130_v44, %v874_v15  ;;  %v2735_v50 = vadd.f32 1.0, %v622_v36  ;;  %v367_v32 = vld [vmem:[%s2431_s19 + $0x150] sm:$0xff]  ;;  %v368_v44 = vld [vmem:[%s2431_s19 + $0x158] sm:$0xff] }
  0x6c   : > { %4003 = vst [vmem:[#allocation20_spill] sm:$0xff] %v2721_v18  ;;  %v876_v46 = vmul.f32 %v2721_v18, %v364_v58  ;;  %v623_v49 = vld [vmem:[%s2439_s21 + $0x150] sm:$0xff]  ;;  %v1259_v61 = vadd.f32 %v1131_v57, %v875_v28  ;;  %v877_v62 = vmul.f32 %v2728_v34, %v365_v6  ;;  %v624_v58 = vld [vmem:[%s2439_s21 + $0x158] sm:$0xff]  ;;  %v369_v57 = vld [vmem:[%s2431_s19 + $0x160] sm:$0xff] }
  0x6d   : > { %4004 = vst [vmem:[#allocation21_spill] sm:$0xff] %v2728_v34  ;;  %v1135_v55 = vld [vmem:[%s2447_s18 + $0x150] sm:$0xff]  ;;  %v2742_v5 = vadd.f32 1.0, %v623_v49  ;;  %v878_v20 = vmul.f32 %v2735_v50, %v366_v19  ;;  %v2749_v36 = vadd.f32 1.0, %v624_v58  ;;  %v625_v6 = vld [vmem:[%s2439_s21 + $0x160] sm:$0xff]  ;;  %v626_v19 = vld [vmem:[%s2439_s21 + $0x168] sm:$0xff] }
  0x6e   : > { %1512 = vst [vmem:[%s2486_s24 + $0x118] sm:$0xff] %v1256_v10  ;;  %v1136_v10 = vld [vmem:[%s2447_s18 + $0x158] sm:$0xff]  ;;  %v1260_v15 = vadd.f32 %v1132_v8, %v876_v46  ;;  %v1261_v28 = vadd.f32 %v1133_v25, %v877_v62  ;;  %v2756_v34 = vadd.f32 1.0, %v625_v6  ;;  %v370_v8 = vld [vmem:[%s2431_s19 + $0x168] sm:$0xff]  ;;  %v371_v25 = vld [vmem:[%s2431_s19 + $0x170] sm:$0xff] }
  0x6f   : > { %4005 = vst [vmem:[#allocation22_spill] sm:$0xff] %v2735_v50  ;;  %v879_v49 = vmul.f32 %v2742_v5, %v367_v32  ;;  %v1262_v46 = vadd.f32 %v1134_v37, %v878_v20  ;;  %v880_v58 = vmul.f32 %v2749_v36, %v368_v44  ;;  %v2763_v50 = vadd.f32 1.0, %v626_v19  ;;  %v627_v32 = vld [vmem:[%s2439_s21 + $0x170] sm:$0xff]  ;;  %v372_v37 = vld [vmem:[%s2431_s19 + $0x178] sm:$0xff]  ;;  %v453_v18 = vld [vmem:[%s2431_s19 + $0x400] sm:$0xff] }
  0x70   : > { %1513 = vst [vmem:[%s2486_s24 + $0x120] sm:$0xff] %v1257_v27  ;;  %v1137_v27 = vld [vmem:[%s2447_s18 + $0x160] sm:$0xff]  ;;  %v881_v6 = vmul.f32 %v2756_v34, %v369_v57  ;;  %v628_v44 = vld [vmem:[%s2439_s21 + $0x178] sm:$0xff] }
  0x71   : > { %4006 = vst [vmem:[#allocation23_spill] sm:$0xff] %v2742_v5  ;;  %v1263_v62 = vadd.f32 %v1135_v55, %v879_v49  ;;  %v2770_v5 = vadd.f32 1.0, %v627_v32  ;;  %v1264_v20 = vadd.f32 %v1136_v10, %v880_v58  ;;  %v882_v19 = vmul.f32 %v2763_v50, %v370_v8  ;;  %v373_v55 = vld [vmem:[%s2431_s19 + $0x180] sm:$0xff]  ;;  %v374_v10 = vld [vmem:[%s2431_s19 + $0x188] sm:$0xff] }
  0x72   : > { %1514 = vst [vmem:[%s2486_s24 + $0x128] sm:$0xff] %v1258_v42  ;;  %v1138_v42 = vld [vmem:[%s2447_s18 + $0x168] sm:$0xff]  ;;  %v629_v57 = vld [vmem:[%s2439_s21 + $0x180] sm:$0xff]  ;;  %v1265_v49 = vadd.f32 %v1137_v27, %v881_v6  ;;  %v375_v27 = vld [vmem:[%s2431_s19 + $0x190] sm:$0xff] }
  0x73   : > { %4007 = vst [vmem:[#allocation24_spill] sm:$0xff] %v2749_v36  ;;  %v2777_v36 = vadd.f32 1.0, %v628_v44  ;;  %v883_v32 = vmul.f32 %v2770_v5, %v371_v25  ;;  %v630_v8 = vld [vmem:[%s2439_s21 + $0x188] sm:$0xff]  ;;  %v1266_v58 = vadd.f32 %v1138_v42, %v882_v19  ;;  %v631_v25 = vld [vmem:[%s2439_s21 + $0x190] sm:$0xff]  ;;  %v376_v42 = vld [vmem:[%s2431_s19 + $0x198] sm:$0xff] }
  0x74   : > { %1515 = vst [vmem:[%s2486_s24 + $0x130] sm:$0xff] %v1259_v61  ;;  %v1139_v61 = vld [vmem:[%s2447_s18 + $0x170] sm:$0xff] }
  0x75   : > { %4008 = vst [vmem:[#allocation25_spill] sm:$0xff] %v2756_v34  ;;  %v2784_v34 = vadd.f32 1.0, %v629_v57  ;;  %v884_v44 = vmul.f32 %v2777_v36, %v372_v37  ;;  %v1267_v6 = vadd.f32 %v1139_v61, %v883_v32  ;;  %v632_v37 = vld [vmem:[%s2439_s21 + $0x198] sm:$0xff]  ;;  %v377_v61 = vld [vmem:[%s2431_s19 + $0x1a0] sm:$0xff] }
  0x76   : > { %1516 = vst [vmem:[%s2486_s24 + $0x138] sm:$0xff] %v1260_v15  ;;  %v1140_v15 = vld [vmem:[%s2447_s18 + $0x178] sm:$0xff] }
  0x77   : > { %4009 = vst [vmem:[#allocation26_spill] sm:$0xff] %v2763_v50  ;;  %v2791_v50 = vadd.f32 1.0, %v630_v8  ;;  %v885_v57 = vmul.f32 %v2784_v34, %v373_v55  ;;  %v1268_v19 = vadd.f32 %v1140_v15, %v884_v44  ;;  %v633_v55 = vld [vmem:[%s2439_s21 + $0x1a0] sm:$0xff]  ;;  %v378_v15 = vld [vmem:[%s2431_s19 + $0x1a8] sm:$0xff] }
  0x78   : > { %1517 = vst [vmem:[%s2486_s24 + $0x140] sm:$0xff] %v1261_v28  ;;  %v1141_v28 = vld [vmem:[%s2447_s18 + $0x180] sm:$0xff] }
  0x79   : > { %4010 = vst [vmem:[#allocation27_spill] sm:$0xff] %v2770_v5  ;;  %v2798_v5 = vadd.f32 1.0, %v631_v25  ;;  %v886_v8 = vmul.f32 %v2791_v50, %v374_v10  ;;  %v1269_v32 = vadd.f32 %v1141_v28, %v885_v57  ;;  %v634_v10 = vld [vmem:[%s2439_s21 + $0x1a8] sm:$0xff]  ;;  %v379_v28 = vld [vmem:[%s2431_s19 + $0x1b0] sm:$0xff] }
  0x7a   : > { %1518 = vst [vmem:[%s2486_s24 + $0x148] sm:$0xff] %v1262_v46  ;;  %v1142_v46 = vld [vmem:[%s2447_s18 + $0x188] sm:$0xff] }
  0x7b   : > { %4011 = vst [vmem:[#allocation28_spill] sm:$0xff] %v2777_v36  ;;  %v2805_v36 = vadd.f32 1.0, %v632_v37  ;;  %v887_v25 = vmul.f32 %v2798_v5, %v375_v27  ;;  %v1270_v44 = vadd.f32 %v1142_v46, %v886_v8  ;;  %v635_v27 = vld [vmem:[%s2439_s21 + $0x1b0] sm:$0xff]  ;;  %v380_v46 = vld [vmem:[%s2431_s19 + $0x1b8] sm:$0xff] }
  0x7c   : > { %1519 = vst [vmem:[%s2486_s24 + $0x150] sm:$0xff] %v1263_v62  ;;  %v1143_v62 = vld [vmem:[%s2447_s18 + $0x190] sm:$0xff] }
  0x7d   : > { %4012 = vst [vmem:[#allocation29_spill] sm:$0xff] %v2784_v34  ;;  %v2812_v34 = vadd.f32 1.0, %v633_v55  ;;  %v888_v37 = vmul.f32 %v2805_v36, %v376_v42  ;;  %v1271_v57 = vadd.f32 %v1143_v62, %v887_v25  ;;  %v636_v42 = vld [vmem:[%s2439_s21 + $0x1b8] sm:$0xff]  ;;  %v381_v62 = vld [vmem:[%s2431_s19 + $0x1c0] sm:$0xff] }
  0x7e   : > { %1520 = vst [vmem:[%s2486_s24 + $0x158] sm:$0xff] %v1264_v20  ;;  %v1144_v20 = vld [vmem:[%s2447_s18 + $0x198] sm:$0xff] }
  0x7f   : > { %4013 = vst [vmem:[#allocation30_spill] sm:$0xff] %v2791_v50  ;;  %v2819_v50 = vadd.f32 1.0, %v634_v10  ;;  %v889_v55 = vmul.f32 %v2812_v34, %v377_v61  ;;  %v1272_v8 = vadd.f32 %v1144_v20, %v888_v37  ;;  %v637_v61 = vld [vmem:[%s2439_s21 + $0x1c0] sm:$0xff]  ;;  %v382_v20 = vld [vmem:[%s2431_s19 + $0x1c8] sm:$0xff] }
  0x80   : > { %1521 = vst [vmem:[%s2486_s24 + $0x160] sm:$0xff] %v1265_v49  ;;  %v1145_v49 = vld [vmem:[%s2447_s18 + $0x1a0] sm:$0xff] }
  0x81   : > { %4014 = vst [vmem:[#allocation31_spill] sm:$0xff] %v2798_v5  ;;  %v2826_v5 = vadd.f32 1.0, %v635_v27  ;;  %v890_v10 = vmul.f32 %v2819_v50, %v378_v15  ;;  %v1273_v25 = vadd.f32 %v1145_v49, %v889_v55  ;;  %v638_v15 = vld [vmem:[%s2439_s21 + $0x1c8] sm:$0xff]  ;;  %v383_v49 = vld [vmem:[%s2431_s19 + $0x1d0] sm:$0xff] }
  0x82   : > { %1522 = vst [vmem:[%s2486_s24 + $0x168] sm:$0xff] %v1266_v58  ;;  %v1146_v58 = vld [vmem:[%s2447_s18 + $0x1a8] sm:$0xff] }
  0x83   : > { %4015 = vst [vmem:[#allocation32_spill] sm:$0xff] %v2805_v36  ;;  %v2833_v36 = vadd.f32 1.0, %v636_v42  ;;  %v891_v27 = vmul.f32 %v2826_v5, %v379_v28  ;;  %v1274_v37 = vadd.f32 %v1146_v58, %v890_v10  ;;  %v639_v28 = vld [vmem:[%s2439_s21 + $0x1d0] sm:$0xff]  ;;  %v384_v58 = vld [vmem:[%s2431_s19 + $0x1d8] sm:$0xff] }
  0x84   : > { %1523 = vst [vmem:[%s2486_s24 + $0x170] sm:$0xff] %v1267_v6  ;;  %v1147_v6 = vld [vmem:[%s2447_s18 + $0x1b0] sm:$0xff] }
  0x85   : > { %4016 = vst [vmem:[#allocation33_spill] sm:$0xff] %v2812_v34  ;;  %v2840_v34 = vadd.f32 1.0, %v637_v61  ;;  %v892_v42 = vmul.f32 %v2833_v36, %v380_v46  ;;  %v1275_v55 = vadd.f32 %v1147_v6, %v891_v27  ;;  %v640_v46 = vld [vmem:[%s2439_s21 + $0x1d8] sm:$0xff]  ;;  %v385_v6 = vld [vmem:[%s2431_s19 + $0x1e0] sm:$0xff] }
  0x86   : > { %1524 = vst [vmem:[%s2486_s24 + $0x178] sm:$0xff] %v1268_v19  ;;  %v1148_v19 = vld [vmem:[%s2447_s18 + $0x1b8] sm:$0xff] }
  0x87   : > { %4017 = vst [vmem:[#allocation34_spill] sm:$0xff] %v2819_v50  ;;  %v2847_v50 = vadd.f32 1.0, %v638_v15  ;;  %v893_v61 = vmul.f32 %v2840_v34, %v381_v62  ;;  %v1276_v10 = vadd.f32 %v1148_v19, %v892_v42  ;;  %v641_v62 = vld [vmem:[%s2439_s21 + $0x1e0] sm:$0xff]  ;;  %v386_v19 = vld [vmem:[%s2431_s19 + $0x1e8] sm:$0xff] }
  0x88   : > { %1525 = vst [vmem:[%s2486_s24 + $0x180] sm:$0xff] %v1269_v32  ;;  %v1149_v32 = vld [vmem:[%s2447_s18 + $0x1c0] sm:$0xff] }
  0x89   : > { %4018 = vst [vmem:[#allocation35_spill] sm:$0xff] %v2826_v5  ;;  %v2854_v5 = vadd.f32 1.0, %v639_v28  ;;  %v894_v15 = vmul.f32 %v2847_v50, %v382_v20  ;;  %v1277_v27 = vadd.f32 %v1149_v32, %v893_v61  ;;  %v642_v20 = vld [vmem:[%s2439_s21 + $0x1e8] sm:$0xff]  ;;  %v387_v32 = vld [vmem:[%s2431_s19 + $0x1f0] sm:$0xff] }
  0x8a   : > { %1526 = vst [vmem:[%s2486_s24 + $0x188] sm:$0xff] %v1270_v44  ;;  %v1150_v44 = vld [vmem:[%s2447_s18 + $0x1c8] sm:$0xff] }
  0x8b   : > { %4019 = vst [vmem:[#allocation36_spill] sm:$0xff] %v2833_v36  ;;  %v2861_v36 = vadd.f32 1.0, %v640_v46  ;;  %v895_v28 = vmul.f32 %v2854_v5, %v383_v49  ;;  %v1278_v42 = vadd.f32 %v1150_v44, %v894_v15  ;;  %v643_v49 = vld [vmem:[%s2439_s21 + $0x1f0] sm:$0xff]  ;;  %v388_v44 = vld [vmem:[%s2431_s19 + $0x1f8] sm:$0xff] }
  0x8c   : > { %1527 = vst [vmem:[%s2486_s24 + $0x190] sm:$0xff] %v1271_v57  ;;  %v1151_v57 = vld [vmem:[%s2447_s18 + $0x1d0] sm:$0xff] }
  0x8d   : > { %4020 = vst [vmem:[#allocation37_spill] sm:$0xff] %v2840_v34  ;;  %v2868_v34 = vadd.f32 1.0, %v641_v62  ;;  %v896_v46 = vmul.f32 %v2861_v36, %v384_v58  ;;  %v1279_v61 = vadd.f32 %v1151_v57, %v895_v28  ;;  %v644_v58 = vld [vmem:[%s2439_s21 + $0x1f8] sm:$0xff]  ;;  %v389_v57 = vld [vmem:[%s2431_s19 + $0x200] sm:$0xff] }
  0x8e   : > { %1528 = vst [vmem:[%s2486_s24 + $0x198] sm:$0xff] %v1272_v8  ;;  %v1152_v8 = vld [vmem:[%s2447_s18 + $0x1d8] sm:$0xff] }
  0x8f   : > { %4021 = vst [vmem:[#allocation38_spill] sm:$0xff] %v2847_v50  ;;  %v2875_v50 = vadd.f32 1.0, %v642_v20  ;;  %v897_v62 = vmul.f32 %v2868_v34, %v385_v6  ;;  %v1280_v15 = vadd.f32 %v1152_v8, %v896_v46  ;;  %v645_v6 = vld [vmem:[%s2439_s21 + $0x200] sm:$0xff]  ;;  %v390_v8 = vld [vmem:[%s2431_s19 + $0x208] sm:$0xff] }
  0x90   : > { %1529 = vst [vmem:[%s2486_s24 + $0x1a0] sm:$0xff] %v1273_v25  ;;  %v1153_v25 = vld [vmem:[%s2447_s18 + $0x1e0] sm:$0xff] }
  0x91   : > { %4022 = vst [vmem:[#allocation39_spill] sm:$0xff] %v2854_v5  ;;  %v2882_v5 = vadd.f32 1.0, %v643_v49  ;;  %v898_v20 = vmul.f32 %v2875_v50, %v386_v19  ;;  %v1281_v28 = vadd.f32 %v1153_v25, %v897_v62  ;;  %v646_v19 = vld [vmem:[%s2439_s21 + $0x208] sm:$0xff]  ;;  %v391_v25 = vld [vmem:[%s2431_s19 + $0x210] sm:$0xff] }
  0x92   : > { %1530 = vst [vmem:[%s2486_s24 + $0x1a8] sm:$0xff] %v1274_v37  ;;  %v1154_v37 = vld [vmem:[%s2447_s18 + $0x1e8] sm:$0xff] }
  0x93   : > { %4023 = vst [vmem:[#allocation40_spill] sm:$0xff] %v2861_v36  ;;  %v2889_v36 = vadd.f32 1.0, %v644_v58  ;;  %v899_v49 = vmul.f32 %v2882_v5, %v387_v32  ;;  %v1282_v46 = vadd.f32 %v1154_v37, %v898_v20  ;;  %v647_v32 = vld [vmem:[%s2439_s21 + $0x210] sm:$0xff]  ;;  %v392_v37 = vld [vmem:[%s2431_s19 + $0x218] sm:$0xff] }
  0x94   : > { %1531 = vst [vmem:[%s2486_s24 + $0x1b0] sm:$0xff] %v1275_v55  ;;  %v1155_v55 = vld [vmem:[%s2447_s18 + $0x1f0] sm:$0xff] }
  0x95   : > { %4024 = vst [vmem:[#allocation41_spill] sm:$0xff] %v2868_v34  ;;  %v2896_v34 = vadd.f32 1.0, %v645_v6  ;;  %v900_v58 = vmul.f32 %v2889_v36, %v388_v44  ;;  %v1283_v62 = vadd.f32 %v1155_v55, %v899_v49  ;;  %v648_v44 = vld [vmem:[%s2439_s21 + $0x218] sm:$0xff]  ;;  %v393_v55 = vld [vmem:[%s2431_s19 + $0x220] sm:$0xff] }
  0x96   : > { %1532 = vst [vmem:[%s2486_s24 + $0x1b8] sm:$0xff] %v1276_v10  ;;  %v1156_v10 = vld [vmem:[%s2447_s18 + $0x1f8] sm:$0xff] }
  0x97   : > { %4025 = vst [vmem:[#allocation42_spill] sm:$0xff] %v2875_v50  ;;  %v2903_v50 = vadd.f32 1.0, %v646_v19  ;;  %v901_v6 = vmul.f32 %v2896_v34, %v389_v57  ;;  %v1284_v20 = vadd.f32 %v1156_v10, %v900_v58  ;;  %v649_v57 = vld [vmem:[%s2439_s21 + $0x220] sm:$0xff]  ;;  %v394_v10 = vld [vmem:[%s2431_s19 + $0x228] sm:$0xff] }
  0x98   : > { %1533 = vst [vmem:[%s2486_s24 + $0x1c0] sm:$0xff] %v1277_v27  ;;  %v1157_v27 = vld [vmem:[%s2447_s18 + $0x200] sm:$0xff] }
  0x99   : > { %4026 = vst [vmem:[#allocation43_spill] sm:$0xff] %v2882_v5  ;;  %v2910_v5 = vadd.f32 1.0, %v647_v32  ;;  %v902_v19 = vmul.f32 %v2903_v50, %v390_v8  ;;  %v1285_v49 = vadd.f32 %v1157_v27, %v901_v6  ;;  %v650_v8 = vld [vmem:[%s2439_s21 + $0x228] sm:$0xff]  ;;  %v395_v27 = vld [vmem:[%s2431_s19 + $0x230] sm:$0xff] }
  0x9a   : > { %1534 = vst [vmem:[%s2486_s24 + $0x1c8] sm:$0xff] %v1278_v42  ;;  %v1158_v42 = vld [vmem:[%s2447_s18 + $0x208] sm:$0xff] }
  0x9b   : > { %4027 = vst [vmem:[#allocation44_spill] sm:$0xff] %v2889_v36  ;;  %v2917_v36 = vadd.f32 1.0, %v648_v44  ;;  %v903_v32 = vmul.f32 %v2910_v5, %v391_v25  ;;  %v1286_v58 = vadd.f32 %v1158_v42, %v902_v19  ;;  %v651_v25 = vld [vmem:[%s2439_s21 + $0x230] sm:$0xff]  ;;  %v396_v42 = vld [vmem:[%s2431_s19 + $0x238] sm:$0xff] }
  0x9c   : > { %1535 = vst [vmem:[%s2486_s24 + $0x1d0] sm:$0xff] %v1279_v61  ;;  %v1159_v61 = vld [vmem:[%s2447_s18 + $0x210] sm:$0xff] }
  0x9d   : > { %4028 = vst [vmem:[#allocation45_spill] sm:$0xff] %v2896_v34  ;;  %v2924_v34 = vadd.f32 1.0, %v649_v57  ;;  %v904_v44 = vmul.f32 %v2917_v36, %v392_v37  ;;  %v1287_v6 = vadd.f32 %v1159_v61, %v903_v32  ;;  %v652_v37 = vld [vmem:[%s2439_s21 + $0x238] sm:$0xff]  ;;  %v397_v61 = vld [vmem:[%s2431_s19 + $0x240] sm:$0xff] }
  0x9e   : > { %1536 = vst [vmem:[%s2486_s24 + $0x1d8] sm:$0xff] %v1280_v15  ;;  %v1160_v15 = vld [vmem:[%s2447_s18 + $0x218] sm:$0xff] }
  0x9f   : > { %4029 = vst [vmem:[#allocation46_spill] sm:$0xff] %v2903_v50  ;;  %v2931_v50 = vadd.f32 1.0, %v650_v8  ;;  %v905_v57 = vmul.f32 %v2924_v34, %v393_v55  ;;  %v1288_v19 = vadd.f32 %v1160_v15, %v904_v44  ;;  %v653_v55 = vld [vmem:[%s2439_s21 + $0x240] sm:$0xff]  ;;  %v398_v15 = vld [vmem:[%s2431_s19 + $0x248] sm:$0xff] }
  0xa0   : > { %1537 = vst [vmem:[%s2486_s24 + $0x1e0] sm:$0xff] %v1281_v28  ;;  %v1161_v28 = vld [vmem:[%s2447_s18 + $0x220] sm:$0xff] }
  0xa1   : > { %4030 = vst [vmem:[#allocation47_spill] sm:$0xff] %v2910_v5  ;;  %v2938_v5 = vadd.f32 1.0, %v651_v25  ;;  %v906_v8 = vmul.f32 %v2931_v50, %v394_v10  ;;  %v1289_v32 = vadd.f32 %v1161_v28, %v905_v57  ;;  %v654_v10 = vld [vmem:[%s2439_s21 + $0x248] sm:$0xff]  ;;  %v399_v28 = vld [vmem:[%s2431_s19 + $0x250] sm:$0xff] }
  0xa2   : > { %1538 = vst [vmem:[%s2486_s24 + $0x1e8] sm:$0xff] %v1282_v46  ;;  %v1162_v46 = vld [vmem:[%s2447_s18 + $0x228] sm:$0xff] }
  0xa3   : > { %4031 = vst [vmem:[#allocation48_spill] sm:$0xff] %v2917_v36  ;;  %v2945_v36 = vadd.f32 1.0, %v652_v37  ;;  %v907_v25 = vmul.f32 %v2938_v5, %v395_v27  ;;  %v1290_v44 = vadd.f32 %v1162_v46, %v906_v8  ;;  %v655_v27 = vld [vmem:[%s2439_s21 + $0x250] sm:$0xff]  ;;  %v400_v46 = vld [vmem:[%s2431_s19 + $0x258] sm:$0xff] }
  0xa4   : > { %1539 = vst [vmem:[%s2486_s24 + $0x1f0] sm:$0xff] %v1283_v62  ;;  %v1163_v62 = vld [vmem:[%s2447_s18 + $0x230] sm:$0xff] }
  0xa5   : > { %4032 = vst [vmem:[#allocation49_spill] sm:$0xff] %v2924_v34  ;;  %v2952_v34 = vadd.f32 1.0, %v653_v55  ;;  %v908_v37 = vmul.f32 %v2945_v36, %v396_v42  ;;  %v1291_v57 = vadd.f32 %v1163_v62, %v907_v25  ;;  %v656_v42 = vld [vmem:[%s2439_s21 + $0x258] sm:$0xff]  ;;  %v401_v62 = vld [vmem:[%s2431_s19 + $0x260] sm:$0xff] }
  0xa6   : > { %1540 = vst [vmem:[%s2486_s24 + $0x1f8] sm:$0xff] %v1284_v20  ;;  %v1164_v20 = vld [vmem:[%s2447_s18 + $0x238] sm:$0xff] }
  0xa7   : > { %4033 = vst [vmem:[#allocation50_spill] sm:$0xff] %v2931_v50  ;;  %v2959_v50 = vadd.f32 1.0, %v654_v10  ;;  %v909_v55 = vmul.f32 %v2952_v34, %v397_v61  ;;  %v1292_v8 = vadd.f32 %v1164_v20, %v908_v37  ;;  %v657_v61 = vld [vmem:[%s2439_s21 + $0x260] sm:$0xff]  ;;  %v402_v20 = vld [vmem:[%s2431_s19 + $0x268] sm:$0xff] }
  0xa8   : > { %1541 = vst [vmem:[%s2486_s24 + $0x200] sm:$0xff] %v1285_v49  ;;  %v1165_v49 = vld [vmem:[%s2447_s18 + $0x240] sm:$0xff] }
  0xa9   : > { %4034 = vst [vmem:[#allocation51_spill] sm:$0xff] %v2938_v5  ;;  %v2966_v5 = vadd.f32 1.0, %v655_v27  ;;  %v910_v10 = vmul.f32 %v2959_v50, %v398_v15  ;;  %v1293_v25 = vadd.f32 %v1165_v49, %v909_v55  ;;  %v658_v15 = vld [vmem:[%s2439_s21 + $0x268] sm:$0xff]  ;;  %v403_v49 = vld [vmem:[%s2431_s19 + $0x270] sm:$0xff] }
  0xaa   : > { %1542 = vst [vmem:[%s2486_s24 + $0x208] sm:$0xff] %v1286_v58  ;;  %v1166_v58 = vld [vmem:[%s2447_s18 + $0x248] sm:$0xff] }
  0xab   : > { %4035 = vst [vmem:[#allocation52_spill] sm:$0xff] %v2945_v36  ;;  %v2973_v36 = vadd.f32 1.0, %v656_v42  ;;  %v911_v27 = vmul.f32 %v2966_v5, %v399_v28  ;;  %v1294_v37 = vadd.f32 %v1166_v58, %v910_v10  ;;  %v659_v28 = vld [vmem:[%s2439_s21 + $0x270] sm:$0xff]  ;;  %v404_v58 = vld [vmem:[%s2431_s19 + $0x278] sm:$0xff] }
  0xac   : > { %1543 = vst [vmem:[%s2486_s24 + $0x210] sm:$0xff] %v1287_v6  ;;  %v1167_v6 = vld [vmem:[%s2447_s18 + $0x250] sm:$0xff] }
  0xad   : > { %4036 = vst [vmem:[#allocation53_spill] sm:$0xff] %v2952_v34  ;;  %v2980_v34 = vadd.f32 1.0, %v657_v61  ;;  %v912_v42 = vmul.f32 %v2973_v36, %v400_v46  ;;  %v1295_v55 = vadd.f32 %v1167_v6, %v911_v27  ;;  %v660_v46 = vld [vmem:[%s2439_s21 + $0x278] sm:$0xff]  ;;  %v405_v6 = vld [vmem:[%s2431_s19 + $0x280] sm:$0xff] }
  0xae   : > { %1544 = vst [vmem:[%s2486_s24 + $0x218] sm:$0xff] %v1288_v19  ;;  %v1168_v19 = vld [vmem:[%s2447_s18 + $0x258] sm:$0xff] }
  0xaf   : > { %4037 = vst [vmem:[#allocation54_spill] sm:$0xff] %v2959_v50  ;;  %v2987_v50 = vadd.f32 1.0, %v658_v15  ;;  %v913_v61 = vmul.f32 %v2980_v34, %v401_v62  ;;  %v1296_v10 = vadd.f32 %v1168_v19, %v912_v42  ;;  %v661_v62 = vld [vmem:[%s2439_s21 + $0x280] sm:$0xff]  ;;  %v406_v19 = vld [vmem:[%s2431_s19 + $0x288] sm:$0xff] }
  0xb0   : > { %1545 = vst [vmem:[%s2486_s24 + $0x220] sm:$0xff] %v1289_v32  ;;  %v1169_v32 = vld [vmem:[%s2447_s18 + $0x260] sm:$0xff] }
  0xb1   : > { %4038 = vst [vmem:[#allocation55_spill] sm:$0xff] %v2966_v5  ;;  %v2994_v5 = vadd.f32 1.0, %v659_v28  ;;  %v914_v15 = vmul.f32 %v2987_v50, %v402_v20  ;;  %v1297_v27 = vadd.f32 %v1169_v32, %v913_v61  ;;  %v662_v20 = vld [vmem:[%s2439_s21 + $0x288] sm:$0xff]  ;;  %v407_v32 = vld [vmem:[%s2431_s19 + $0x290] sm:$0xff] }
  0xb2   : > { %1546 = vst [vmem:[%s2486_s24 + $0x228] sm:$0xff] %v1290_v44  ;;  %v1170_v44 = vld [vmem:[%s2447_s18 + $0x268] sm:$0xff] }
  0xb3   : > { %4039 = vst [vmem:[#allocation56_spill] sm:$0xff] %v2973_v36  ;;  %v3001_v36 = vadd.f32 1.0, %v660_v46  ;;  %v915_v28 = vmul.f32 %v2994_v5, %v403_v49  ;;  %v1298_v42 = vadd.f32 %v1170_v44, %v914_v15  ;;  %v663_v49 = vld [vmem:[%s2439_s21 + $0x290] sm:$0xff]  ;;  %v408_v44 = vld [vmem:[%s2431_s19 + $0x298] sm:$0xff] }
  0xb4   : > { %1547 = vst [vmem:[%s2486_s24 + $0x230] sm:$0xff] %v1291_v57  ;;  %v1171_v57 = vld [vmem:[%s2447_s18 + $0x270] sm:$0xff] }
  0xb5   : > { %4040 = vst [vmem:[#allocation57_spill] sm:$0xff] %v2980_v34  ;;  %v3008_v34 = vadd.f32 1.0, %v661_v62  ;;  %v916_v46 = vmul.f32 %v3001_v36, %v404_v58  ;;  %v1299_v61 = vadd.f32 %v1171_v57, %v915_v28  ;;  %v664_v58 = vld [vmem:[%s2439_s21 + $0x298] sm:$0xff]  ;;  %v409_v57 = vld [vmem:[%s2431_s19 + $0x2a0] sm:$0xff] }
  0xb6   : > { %1548 = vst [vmem:[%s2486_s24 + $0x238] sm:$0xff] %v1292_v8  ;;  %v1172_v8 = vld [vmem:[%s2447_s18 + $0x278] sm:$0xff] }
  0xb7   : > { %4041 = vst [vmem:[#allocation58_spill] sm:$0xff] %v2987_v50  ;;  %v3015_v50 = vadd.f32 1.0, %v662_v20  ;;  %v917_v62 = vmul.f32 %v3008_v34, %v405_v6  ;;  %v1300_v15 = vadd.f32 %v1172_v8, %v916_v46  ;;  %v665_v6 = vld [vmem:[%s2439_s21 + $0x2a0] sm:$0xff]  ;;  %v410_v8 = vld [vmem:[%s2431_s19 + $0x2a8] sm:$0xff] }
  0xb8   : > { %1549 = vst [vmem:[%s2486_s24 + $0x240] sm:$0xff] %v1293_v25  ;;  %v1173_v25 = vld [vmem:[%s2447_s18 + $0x280] sm:$0xff] }
  0xb9   : > { %4042 = vst [vmem:[#allocation59_spill] sm:$0xff] %v2994_v5  ;;  %v3022_v5 = vadd.f32 1.0, %v663_v49  ;;  %v918_v20 = vmul.f32 %v3015_v50, %v406_v19  ;;  %v1301_v28 = vadd.f32 %v1173_v25, %v917_v62  ;;  %v666_v19 = vld [vmem:[%s2439_s21 + $0x2a8] sm:$0xff]  ;;  %v411_v25 = vld [vmem:[%s2431_s19 + $0x2b0] sm:$0xff] }
  0xba   : > { %1550 = vst [vmem:[%s2486_s24 + $0x248] sm:$0xff] %v1294_v37  ;;  %v1174_v37 = vld [vmem:[%s2447_s18 + $0x288] sm:$0xff] }
  0xbb   : > { %4043 = vst [vmem:[#allocation60_spill] sm:$0xff] %v3001_v36  ;;  %v3029_v36 = vadd.f32 1.0, %v664_v58  ;;  %v919_v49 = vmul.f32 %v3022_v5, %v407_v32  ;;  %v1302_v46 = vadd.f32 %v1174_v37, %v918_v20  ;;  %v667_v32 = vld [vmem:[%s2439_s21 + $0x2b0] sm:$0xff]  ;;  %v412_v37 = vld [vmem:[%s2431_s19 + $0x2b8] sm:$0xff] }
  0xbc   : > { %1551 = vst [vmem:[%s2486_s24 + $0x250] sm:$0xff] %v1295_v55  ;;  %v1175_v55 = vld [vmem:[%s2447_s18 + $0x290] sm:$0xff] }
  0xbd   : > { %4044 = vst [vmem:[#allocation61_spill] sm:$0xff] %v3008_v34  ;;  %v3036_v34 = vadd.f32 1.0, %v665_v6  ;;  %v920_v58 = vmul.f32 %v3029_v36, %v408_v44  ;;  %v1303_v62 = vadd.f32 %v1175_v55, %v919_v49  ;;  %v668_v44 = vld [vmem:[%s2439_s21 + $0x2b8] sm:$0xff]  ;;  %v413_v55 = vld [vmem:[%s2431_s19 + $0x2c0] sm:$0xff] }
  0xbe   : > { %1552 = vst [vmem:[%s2486_s24 + $0x258] sm:$0xff] %v1296_v10  ;;  %v1176_v10 = vld [vmem:[%s2447_s18 + $0x298] sm:$0xff] }
  0xbf   : > { %4045 = vst [vmem:[#allocation62_spill] sm:$0xff] %v3015_v50  ;;  %v3043_v50 = vadd.f32 1.0, %v666_v19  ;;  %v921_v6 = vmul.f32 %v3036_v34, %v409_v57  ;;  %v1304_v20 = vadd.f32 %v1176_v10, %v920_v58  ;;  %v669_v57 = vld [vmem:[%s2439_s21 + $0x2c0] sm:$0xff]  ;;  %v414_v10 = vld [vmem:[%s2431_s19 + $0x2c8] sm:$0xff] }
  0xc0   : > { %1553 = vst [vmem:[%s2486_s24 + $0x260] sm:$0xff] %v1297_v27  ;;  %v1177_v27 = vld [vmem:[%s2447_s18 + $0x2a0] sm:$0xff] }
  0xc1   : > { %4046 = vst [vmem:[#allocation63_spill] sm:$0xff] %v3022_v5  ;;  %v3050_v5 = vadd.f32 1.0, %v667_v32  ;;  %v922_v19 = vmul.f32 %v3043_v50, %v410_v8  ;;  %v1305_v49 = vadd.f32 %v1177_v27, %v921_v6  ;;  %v670_v8 = vld [vmem:[%s2439_s21 + $0x2c8] sm:$0xff]  ;;  %v415_v27 = vld [vmem:[%s2431_s19 + $0x2d0] sm:$0xff] }
  0xc2   : > { %1554 = vst [vmem:[%s2486_s24 + $0x268] sm:$0xff] %v1298_v42  ;;  %v1178_v42 = vld [vmem:[%s2447_s18 + $0x2a8] sm:$0xff] }
  0xc3   : > { %4047 = vst [vmem:[#allocation64_spill] sm:$0xff] %v3029_v36  ;;  %v3057_v36 = vadd.f32 1.0, %v668_v44  ;;  %v923_v32 = vmul.f32 %v3050_v5, %v411_v25  ;;  %v1306_v58 = vadd.f32 %v1178_v42, %v922_v19  ;;  %v671_v25 = vld [vmem:[%s2439_s21 + $0x2d0] sm:$0xff]  ;;  %v416_v42 = vld [vmem:[%s2431_s19 + $0x2d8] sm:$0xff] }
  0xc4   : > { %1555 = vst [vmem:[%s2486_s24 + $0x270] sm:$0xff] %v1299_v61  ;;  %v1179_v61 = vld [vmem:[%s2447_s18 + $0x2b0] sm:$0xff] }
  0xc5   : > { %4048 = vst [vmem:[#allocation65_spill] sm:$0xff] %v3036_v34  ;;  %v3064_v34 = vadd.f32 1.0, %v669_v57  ;;  %v924_v44 = vmul.f32 %v3057_v36, %v412_v37  ;;  %v1307_v6 = vadd.f32 %v1179_v61, %v923_v32  ;;  %v672_v37 = vld [vmem:[%s2439_s21 + $0x2d8] sm:$0xff]  ;;  %v417_v61 = vld [vmem:[%s2431_s19 + $0x2e0] sm:$0xff] }
  0xc6   : > { %1556 = vst [vmem:[%s2486_s24 + $0x278] sm:$0xff] %v1300_v15  ;;  %v1180_v15 = vld [vmem:[%s2447_s18 + $0x2b8] sm:$0xff] }
  0xc7   : > { %4049 = vst [vmem:[#allocation66_spill] sm:$0xff] %v3043_v50  ;;  %v3071_v50 = vadd.f32 1.0, %v670_v8  ;;  %v925_v57 = vmul.f32 %v3064_v34, %v413_v55  ;;  %v1308_v19 = vadd.f32 %v1180_v15, %v924_v44  ;;  %v673_v55 = vld [vmem:[%s2439_s21 + $0x2e0] sm:$0xff]  ;;  %v418_v15 = vld [vmem:[%s2431_s19 + $0x2e8] sm:$0xff] }
  0xc8   : > { %1557 = vst [vmem:[%s2486_s24 + $0x280] sm:$0xff] %v1301_v28  ;;  %v1181_v28 = vld [vmem:[%s2447_s18 + $0x2c0] sm:$0xff] }
  0xc9   : > { %4050 = vst [vmem:[#allocation67_spill] sm:$0xff] %v3050_v5  ;;  %v3078_v5 = vadd.f32 1.0, %v671_v25  ;;  %v926_v8 = vmul.f32 %v3071_v50, %v414_v10  ;;  %v1309_v32 = vadd.f32 %v1181_v28, %v925_v57  ;;  %v674_v10 = vld [vmem:[%s2439_s21 + $0x2e8] sm:$0xff]  ;;  %v419_v28 = vld [vmem:[%s2431_s19 + $0x2f0] sm:$0xff] }
  0xca   : > { %1558 = vst [vmem:[%s2486_s24 + $0x288] sm:$0xff] %v1302_v46  ;;  %v1182_v46 = vld [vmem:[%s2447_s18 + $0x2c8] sm:$0xff] }
  0xcb   : > { %4051 = vst [vmem:[#allocation68_spill] sm:$0xff] %v3057_v36  ;;  %v3085_v36 = vadd.f32 1.0, %v672_v37  ;;  %v927_v25 = vmul.f32 %v3078_v5, %v415_v27  ;;  %v1310_v44 = vadd.f32 %v1182_v46, %v926_v8  ;;  %v675_v27 = vld [vmem:[%s2439_s21 + $0x2f0] sm:$0xff]  ;;  %v420_v46 = vld [vmem:[%s2431_s19 + $0x2f8] sm:$0xff] }
  0xcc   : > { %1559 = vst [vmem:[%s2486_s24 + $0x290] sm:$0xff] %v1303_v62  ;;  %v1183_v62 = vld [vmem:[%s2447_s18 + $0x2d0] sm:$0xff] }
  0xcd   : > { %4052 = vst [vmem:[#allocation69_spill] sm:$0xff] %v3064_v34  ;;  %v3092_v34 = vadd.f32 1.0, %v673_v55  ;;  %v928_v37 = vmul.f32 %v3085_v36, %v416_v42  ;;  %v1311_v57 = vadd.f32 %v1183_v62, %v927_v25  ;;  %v676_v42 = vld [vmem:[%s2439_s21 + $0x2f8] sm:$0xff]  ;;  %v421_v62 = vld [vmem:[%s2431_s19 + $0x300] sm:$0xff] }
  0xce   : > { %1560 = vst [vmem:[%s2486_s24 + $0x298] sm:$0xff] %v1304_v20  ;;  %v1184_v20 = vld [vmem:[%s2447_s18 + $0x2d8] sm:$0xff] }
  0xcf   : > { %4053 = vst [vmem:[#allocation70_spill] sm:$0xff] %v3071_v50  ;;  %v3099_v50 = vadd.f32 1.0, %v674_v10  ;;  %v929_v55 = vmul.f32 %v3092_v34, %v417_v61  ;;  %v1312_v8 = vadd.f32 %v1184_v20, %v928_v37  ;;  %v677_v61 = vld [vmem:[%s2439_s21 + $0x300] sm:$0xff]  ;;  %v422_v20 = vld [vmem:[%s2431_s19 + $0x308] sm:$0xff] }
  0xd0   : > { %1561 = vst [vmem:[%s2486_s24 + $0x2a0] sm:$0xff] %v1305_v49  ;;  %v1185_v49 = vld [vmem:[%s2447_s18 + $0x2e0] sm:$0xff] }
  0xd1   : > { %4054 = vst [vmem:[#allocation71_spill] sm:$0xff] %v3078_v5  ;;  %v3106_v5 = vadd.f32 1.0, %v675_v27  ;;  %v930_v10 = vmul.f32 %v3099_v50, %v418_v15  ;;  %v1313_v25 = vadd.f32 %v1185_v49, %v929_v55  ;;  %v678_v15 = vld [vmem:[%s2439_s21 + $0x308] sm:$0xff]  ;;  %v423_v49 = vld [vmem:[%s2431_s19 + $0x310] sm:$0xff] }
  0xd2   : > { %1562 = vst [vmem:[%s2486_s24 + $0x2a8] sm:$0xff] %v1306_v58  ;;  %v1186_v58 = vld [vmem:[%s2447_s18 + $0x2e8] sm:$0xff] }
  0xd3   : > { %4055 = vst [vmem:[#allocation72_spill] sm:$0xff] %v3085_v36  ;;  %v3113_v36 = vadd.f32 1.0, %v676_v42  ;;  %v931_v27 = vmul.f32 %v3106_v5, %v419_v28  ;;  %v1314_v37 = vadd.f32 %v1186_v58, %v930_v10  ;;  %v679_v28 = vld [vmem:[%s2439_s21 + $0x310] sm:$0xff]  ;;  %v424_v58 = vld [vmem:[%s2431_s19 + $0x318] sm:$0xff] }
  0xd4   : > { %1563 = vst [vmem:[%s2486_s24 + $0x2b0] sm:$0xff] %v1307_v6  ;;  %v1187_v6 = vld [vmem:[%s2447_s18 + $0x2f0] sm:$0xff] }
  0xd5   : > { %4056 = vst [vmem:[#allocation73_spill] sm:$0xff] %v3092_v34  ;;  %v3120_v34 = vadd.f32 1.0, %v677_v61  ;;  %v932_v42 = vmul.f32 %v3113_v36, %v420_v46  ;;  %v1315_v55 = vadd.f32 %v1187_v6, %v931_v27  ;;  %v680_v46 = vld [vmem:[%s2439_s21 + $0x318] sm:$0xff]  ;;  %v425_v6 = vld [vmem:[%s2431_s19 + $0x320] sm:$0xff] }
  0xd6   : > { %1564 = vst [vmem:[%s2486_s24 + $0x2b8] sm:$0xff] %v1308_v19  ;;  %v1188_v19 = vld [vmem:[%s2447_s18 + $0x2f8] sm:$0xff] }
  0xd7   : > { %4057 = vst [vmem:[#allocation74_spill] sm:$0xff] %v3099_v50  ;;  %v3127_v50 = vadd.f32 1.0, %v678_v15  ;;  %v933_v61 = vmul.f32 %v3120_v34, %v421_v62  ;;  %v1316_v10 = vadd.f32 %v1188_v19, %v932_v42  ;;  %v681_v62 = vld [vmem:[%s2439_s21 + $0x320] sm:$0xff]  ;;  %v426_v19 = vld [vmem:[%s2431_s19 + $0x328] sm:$0xff] }
  0xd8   : > { %1565 = vst [vmem:[%s2486_s24 + $0x2c0] sm:$0xff] %v1309_v32  ;;  %v1189_v32 = vld [vmem:[%s2447_s18 + $0x300] sm:$0xff] }
  0xd9   : > { %4058 = vst [vmem:[#allocation75_spill] sm:$0xff] %v3106_v5  ;;  %v3134_v5 = vadd.f32 1.0, %v679_v28  ;;  %v934_v15 = vmul.f32 %v3127_v50, %v422_v20  ;;  %v1317_v27 = vadd.f32 %v1189_v32, %v933_v61  ;;  %v682_v20 = vld [vmem:[%s2439_s21 + $0x328] sm:$0xff]  ;;  %v427_v32 = vld [vmem:[%s2431_s19 + $0x330] sm:$0xff] }
  0xda   : > { %1566 = vst [vmem:[%s2486_s24 + $0x2c8] sm:$0xff] %v1310_v44  ;;  %v1190_v44 = vld [vmem:[%s2447_s18 + $0x308] sm:$0xff] }
  0xdb   : > { %4059 = vst [vmem:[#allocation76_spill] sm:$0xff] %v3113_v36  ;;  %v3141_v36 = vadd.f32 1.0, %v680_v46  ;;  %v935_v28 = vmul.f32 %v3134_v5, %v423_v49  ;;  %v1318_v42 = vadd.f32 %v1190_v44, %v934_v15  ;;  %v683_v49 = vld [vmem:[%s2439_s21 + $0x330] sm:$0xff]  ;;  %v428_v44 = vld [vmem:[%s2431_s19 + $0x338] sm:$0xff] }
  0xdc   : > { %1567 = vst [vmem:[%s2486_s24 + $0x2d0] sm:$0xff] %v1311_v57  ;;  %v1191_v57 = vld [vmem:[%s2447_s18 + $0x310] sm:$0xff] }
  0xdd   : > { %4060 = vst [vmem:[#allocation77_spill] sm:$0xff] %v3120_v34  ;;  %v3148_v34 = vadd.f32 1.0, %v681_v62  ;;  %v936_v46 = vmul.f32 %v3141_v36, %v424_v58  ;;  %v1319_v61 = vadd.f32 %v1191_v57, %v935_v28  ;;  %v684_v58 = vld [vmem:[%s2439_s21 + $0x338] sm:$0xff]  ;;  %v429_v57 = vld [vmem:[%s2431_s19 + $0x340] sm:$0xff] }
  0xde   : > { %1568 = vst [vmem:[%s2486_s24 + $0x2d8] sm:$0xff] %v1312_v8  ;;  %v1192_v8 = vld [vmem:[%s2447_s18 + $0x318] sm:$0xff] }
  0xdf   : > { %4061 = vst [vmem:[#allocation78_spill] sm:$0xff] %v3127_v50  ;;  %v3155_v50 = vadd.f32 1.0, %v682_v20  ;;  %v937_v62 = vmul.f32 %v3148_v34, %v425_v6  ;;  %v1320_v15 = vadd.f32 %v1192_v8, %v936_v46  ;;  %v685_v6 = vld [vmem:[%s2439_s21 + $0x340] sm:$0xff]  ;;  %v430_v8 = vld [vmem:[%s2431_s19 + $0x348] sm:$0xff] }
  0xe0   : > { %1569 = vst [vmem:[%s2486_s24 + $0x2e0] sm:$0xff] %v1313_v25  ;;  %v1193_v25 = vld [vmem:[%s2447_s18 + $0x320] sm:$0xff] }
  0xe1   : > { %4062 = vst [vmem:[#allocation79_spill] sm:$0xff] %v3134_v5  ;;  %v3162_v5 = vadd.f32 1.0, %v683_v49  ;;  %v938_v20 = vmul.f32 %v3155_v50, %v426_v19  ;;  %v1321_v28 = vadd.f32 %v1193_v25, %v937_v62  ;;  %v686_v19 = vld [vmem:[%s2439_s21 + $0x348] sm:$0xff]  ;;  %v431_v25 = vld [vmem:[%s2431_s19 + $0x350] sm:$0xff] }
  0xe2   : > { %1570 = vst [vmem:[%s2486_s24 + $0x2e8] sm:$0xff] %v1314_v37  ;;  %v1194_v37 = vld [vmem:[%s2447_s18 + $0x328] sm:$0xff] }
  0xe3   : > { %4063 = vst [vmem:[#allocation80_spill] sm:$0xff] %v3141_v36  ;;  %v3169_v36 = vadd.f32 1.0, %v684_v58  ;;  %v939_v49 = vmul.f32 %v3162_v5, %v427_v32  ;;  %v1322_v46 = vadd.f32 %v1194_v37, %v938_v20  ;;  %v687_v32 = vld [vmem:[%s2439_s21 + $0x350] sm:$0xff]  ;;  %v432_v37 = vld [vmem:[%s2431_s19 + $0x358] sm:$0xff] }
  0xe4   : > { %1571 = vst [vmem:[%s2486_s24 + $0x2f0] sm:$0xff] %v1315_v55  ;;  %v1195_v55 = vld [vmem:[%s2447_s18 + $0x330] sm:$0xff] }
  0xe5   : > { %4064 = vst [vmem:[#allocation81_spill] sm:$0xff] %v3148_v34  ;;  %v3176_v34 = vadd.f32 1.0, %v685_v6  ;;  %v940_v58 = vmul.f32 %v3169_v36, %v428_v44  ;;  %v1323_v62 = vadd.f32 %v1195_v55, %v939_v49  ;;  %v688_v44 = vld [vmem:[%s2439_s21 + $0x358] sm:$0xff]  ;;  %v433_v55 = vld [vmem:[%s2431_s19 + $0x360] sm:$0xff] }
  0xe6   : > { %1572 = vst [vmem:[%s2486_s24 + $0x2f8] sm:$0xff] %v1316_v10  ;;  %v1196_v10 = vld [vmem:[%s2447_s18 + $0x338] sm:$0xff] }
  0xe7   : > { %4065 = vst [vmem:[#allocation82_spill] sm:$0xff] %v3155_v50  ;;  %v3183_v50 = vadd.f32 1.0, %v686_v19  ;;  %v941_v6 = vmul.f32 %v3176_v34, %v429_v57  ;;  %v1324_v20 = vadd.f32 %v1196_v10, %v940_v58  ;;  %v689_v57 = vld [vmem:[%s2439_s21 + $0x360] sm:$0xff]  ;;  %v434_v10 = vld [vmem:[%s2431_s19 + $0x368] sm:$0xff] }
  0xe8   : > { %1573 = vst [vmem:[%s2486_s24 + $0x300] sm:$0xff] %v1317_v27  ;;  %v1197_v27 = vld [vmem:[%s2447_s18 + $0x340] sm:$0xff] }
  0xe9   : > { %4066 = vst [vmem:[#allocation83_spill] sm:$0xff] %v3162_v5  ;;  %v3190_v5 = vadd.f32 1.0, %v687_v32  ;;  %v942_v19 = vmul.f32 %v3183_v50, %v430_v8  ;;  %v1325_v49 = vadd.f32 %v1197_v27, %v941_v6  ;;  %v690_v8 = vld [vmem:[%s2439_s21 + $0x368] sm:$0xff]  ;;  %v435_v27 = vld [vmem:[%s2431_s19 + $0x370] sm:$0xff] }
  0xea   : > { %1574 = vst [vmem:[%s2486_s24 + $0x308] sm:$0xff] %v1318_v42  ;;  %v1198_v42 = vld [vmem:[%s2447_s18 + $0x348] sm:$0xff] }
  0xeb   : > { %4067 = vst [vmem:[#allocation84_spill] sm:$0xff] %v3169_v36  ;;  %v3197_v36 = vadd.f32 1.0, %v688_v44  ;;  %v943_v32 = vmul.f32 %v3190_v5, %v431_v25  ;;  %v1326_v58 = vadd.f32 %v1198_v42, %v942_v19  ;;  %v691_v25 = vld [vmem:[%s2439_s21 + $0x370] sm:$0xff]  ;;  %v436_v42 = vld [vmem:[%s2431_s19 + $0x378] sm:$0xff] }
  0xec   : > { %1575 = vst [vmem:[%s2486_s24 + $0x310] sm:$0xff] %v1319_v61  ;;  %v1199_v61 = vld [vmem:[%s2447_s18 + $0x350] sm:$0xff] }
  0xed   : > { %4068 = vst [vmem:[#allocation85_spill] sm:$0xff] %v3176_v34  ;;  %v3204_v34 = vadd.f32 1.0, %v689_v57  ;;  %v944_v44 = vmul.f32 %v3197_v36, %v432_v37  ;;  %v1327_v6 = vadd.f32 %v1199_v61, %v943_v32  ;;  %v692_v37 = vld [vmem:[%s2439_s21 + $0x378] sm:$0xff]  ;;  %v437_v61 = vld [vmem:[%s2431_s19 + $0x380] sm:$0xff] }
  0xee   : > { %1576 = vst [vmem:[%s2486_s24 + $0x318] sm:$0xff] %v1320_v15  ;;  %v1200_v15 = vld [vmem:[%s2447_s18 + $0x358] sm:$0xff] }
  0xef   : > { %4069 = vst [vmem:[#allocation86_spill] sm:$0xff] %v3183_v50  ;;  %v3211_v50 = vadd.f32 1.0, %v690_v8  ;;  %v945_v57 = vmul.f32 %v3204_v34, %v433_v55  ;;  %v1328_v19 = vadd.f32 %v1200_v15, %v944_v44  ;;  %v693_v55 = vld [vmem:[%s2439_s21 + $0x380] sm:$0xff]  ;;  %v438_v15 = vld [vmem:[%s2431_s19 + $0x388] sm:$0xff] }
  0xf0   : > { %1577 = vst [vmem:[%s2486_s24 + $0x320] sm:$0xff] %v1321_v28  ;;  %v1201_v28 = vld [vmem:[%s2447_s18 + $0x360] sm:$0xff] }
  0xf1   : > { %4070 = vst [vmem:[#allocation87_spill] sm:$0xff] %v3190_v5  ;;  %v3218_v5 = vadd.f32 1.0, %v691_v25  ;;  %v946_v8 = vmul.f32 %v3211_v50, %v434_v10  ;;  %v1329_v32 = vadd.f32 %v1201_v28, %v945_v57  ;;  %v694_v10 = vld [vmem:[%s2439_s21 + $0x388] sm:$0xff]  ;;  %v439_v28 = vld [vmem:[%s2431_s19 + $0x390] sm:$0xff] }
  0xf2   : > { %1578 = vst [vmem:[%s2486_s24 + $0x328] sm:$0xff] %v1322_v46  ;;  %v1202_v46 = vld [vmem:[%s2447_s18 + $0x368] sm:$0xff] }
  0xf3   : > { %4071 = vst [vmem:[#allocation88_spill] sm:$0xff] %v3197_v36  ;;  %v3225_v36 = vadd.f32 1.0, %v692_v37  ;;  %v947_v25 = vmul.f32 %v3218_v5, %v435_v27  ;;  %v1330_v44 = vadd.f32 %v1202_v46, %v946_v8  ;;  %v695_v27 = vld [vmem:[%s2439_s21 + $0x390] sm:$0xff]  ;;  %v440_v46 = vld [vmem:[%s2431_s19 + $0x398] sm:$0xff] }
  0xf4   : > { %1579 = vst [vmem:[%s2486_s24 + $0x330] sm:$0xff] %v1323_v62  ;;  %v1203_v62 = vld [vmem:[%s2447_s18 + $0x370] sm:$0xff] }
  0xf5   : > { %4072 = vst [vmem:[#allocation89_spill] sm:$0xff] %v3204_v34  ;;  %v3232_v34 = vadd.f32 1.0, %v693_v55  ;;  %v948_v37 = vmul.f32 %v3225_v36, %v436_v42  ;;  %v1331_v57 = vadd.f32 %v1203_v62, %v947_v25  ;;  %v696_v42 = vld [vmem:[%s2439_s21 + $0x398] sm:$0xff]  ;;  %v441_v62 = vld [vmem:[%s2431_s19 + $0x3a0] sm:$0xff] }
  0xf6   : > { %1580 = vst [vmem:[%s2486_s24 + $0x338] sm:$0xff] %v1324_v20  ;;  %v1204_v20 = vld [vmem:[%s2447_s18 + $0x378] sm:$0xff] }
  0xf7   : > { %4073 = vst [vmem:[#allocation90_spill] sm:$0xff] %v3211_v50  ;;  %v3239_v50 = vadd.f32 1.0, %v694_v10  ;;  %v949_v55 = vmul.f32 %v3232_v34, %v437_v61  ;;  %v1332_v8 = vadd.f32 %v1204_v20, %v948_v37  ;;  %v697_v61 = vld [vmem:[%s2439_s21 + $0x3a0] sm:$0xff]  ;;  %v442_v20 = vld [vmem:[%s2431_s19 + $0x3a8] sm:$0xff] }
  0xf8   : > { %1581 = vst [vmem:[%s2486_s24 + $0x340] sm:$0xff] %v1325_v49  ;;  %v1205_v49 = vld [vmem:[%s2447_s18 + $0x380] sm:$0xff] }
  0xf9   : > { %4074 = vst [vmem:[#allocation91_spill] sm:$0xff] %v3218_v5  ;;  %v3246_v5 = vadd.f32 1.0, %v695_v27  ;;  %v950_v10 = vmul.f32 %v3239_v50, %v438_v15  ;;  %v1333_v25 = vadd.f32 %v1205_v49, %v949_v55  ;;  %v698_v15 = vld [vmem:[%s2439_s21 + $0x3a8] sm:$0xff]  ;;  %v443_v49 = vld [vmem:[%s2431_s19 + $0x3b0] sm:$0xff] }
  0xfa   : > { %1582 = vst [vmem:[%s2486_s24 + $0x348] sm:$0xff] %v1326_v58  ;;  %v1206_v58 = vld [vmem:[%s2447_s18 + $0x388] sm:$0xff] }
  0xfb   : > { %4075 = vst [vmem:[#allocation92_spill] sm:$0xff] %v3225_v36  ;;  %v3253_v36 = vadd.f32 1.0, %v696_v42  ;;  %v951_v27 = vmul.f32 %v3246_v5, %v439_v28  ;;  %v1334_v37 = vadd.f32 %v1206_v58, %v950_v10  ;;  %v699_v28 = vld [vmem:[%s2439_s21 + $0x3b0] sm:$0xff]  ;;  %v444_v58 = vld [vmem:[%s2431_s19 + $0x3b8] sm:$0xff] }
  0xfc   : > { %1583 = vst [vmem:[%s2486_s24 + $0x350] sm:$0xff] %v1327_v6  ;;  %v1207_v6 = vld [vmem:[%s2447_s18 + $0x390] sm:$0xff] }
  0xfd   : > { %4076 = vst [vmem:[#allocation93_spill] sm:$0xff] %v3232_v34  ;;  %v3260_v34 = vadd.f32 1.0, %v697_v61  ;;  %v952_v42 = vmul.f32 %v3253_v36, %v440_v46  ;;  %v1335_v55 = vadd.f32 %v1207_v6, %v951_v27  ;;  %v700_v46 = vld [vmem:[%s2439_s21 + $0x3b8] sm:$0xff]  ;;  %v445_v6 = vld [vmem:[%s2431_s19 + $0x3c0] sm:$0xff] }
  0xfe   : > { %1584 = vst [vmem:[%s2486_s24 + $0x358] sm:$0xff] %v1328_v19  ;;  %v1208_v19 = vld [vmem:[%s2447_s18 + $0x398] sm:$0xff] }
  0xff   : > { %4077 = vst [vmem:[#allocation94_spill] sm:$0xff] %v3239_v50  ;;  %v3267_v50 = vadd.f32 1.0, %v698_v15  ;;  %v953_v61 = vmul.f32 %v3260_v34, %v441_v62  ;;  %v1336_v10 = vadd.f32 %v1208_v19, %v952_v42  ;;  %v701_v62 = vld [vmem:[%s2439_s21 + $0x3c0] sm:$0xff]  ;;  %v446_v19 = vld [vmem:[%s2431_s19 + $0x3c8] sm:$0xff] }
 0x100   : > { %1585 = vst [vmem:[%s2486_s24 + $0x360] sm:$0xff] %v1329_v32  ;;  %v1209_v32 = vld [vmem:[%s2447_s18 + $0x3a0] sm:$0xff] }
 0x101   : > { %4078 = vst [vmem:[#allocation95_spill] sm:$0xff] %v3246_v5  ;;  %v3274_v5 = vadd.f32 1.0, %v699_v28  ;;  %v954_v15 = vmul.f32 %v3267_v50, %v442_v20  ;;  %v1337_v27 = vadd.f32 %v1209_v32, %v953_v61  ;;  %v702_v20 = vld [vmem:[%s2439_s21 + $0x3c8] sm:$0xff]  ;;  %v447_v32 = vld [vmem:[%s2431_s19 + $0x3d0] sm:$0xff] }
 0x102   : > { %1586 = vst [vmem:[%s2486_s24 + $0x368] sm:$0xff] %v1330_v44  ;;  %v1210_v44 = vld [vmem:[%s2447_s18 + $0x3a8] sm:$0xff] }
 0x103   : > { %4079 = vst [vmem:[#allocation96_spill] sm:$0xff] %v3253_v36  ;;  %v3281_v36 = vadd.f32 1.0, %v700_v46  ;;  %v955_v28 = vmul.f32 %v3274_v5, %v443_v49  ;;  %v1338_v42 = vadd.f32 %v1210_v44, %v954_v15  ;;  %v703_v49 = vld [vmem:[%s2439_s21 + $0x3d0] sm:$0xff]  ;;  %v448_v44 = vld [vmem:[%s2431_s19 + $0x3d8] sm:$0xff] }
 0x104   : > { %1587 = vst [vmem:[%s2486_s24 + $0x370] sm:$0xff] %v1331_v57  ;;  %v1211_v57 = vld [vmem:[%s2447_s18 + $0x3b0] sm:$0xff] }
 0x105   : > { %4080 = vst [vmem:[#allocation97_spill] sm:$0xff] %v3260_v34  ;;  %v3288_v34 = vadd.f32 1.0, %v701_v62  ;;  %v956_v46 = vmul.f32 %v3281_v36, %v444_v58  ;;  %v1339_v61 = vadd.f32 %v1211_v57, %v955_v28  ;;  %v704_v58 = vld [vmem:[%s2439_s21 + $0x3d8] sm:$0xff]  ;;  %v449_v57 = vld [vmem:[%s2431_s19 + $0x3e0] sm:$0xff] }
 0x106   : > { %1588 = vst [vmem:[%s2486_s24 + $0x378] sm:$0xff] %v1332_v8  ;;  %v1212_v8 = vld [vmem:[%s2447_s18 + $0x3b8] sm:$0xff] }
 0x107   : > { %4081 = vst [vmem:[#allocation98_spill] sm:$0xff] %v3267_v50  ;;  %v3295_v50 = vadd.f32 1.0, %v702_v20  ;;  %v957_v62 = vmul.f32 %v3288_v34, %v445_v6  ;;  %v1340_v15 = vadd.f32 %v1212_v8, %v956_v46  ;;  %v705_v6 = vld [vmem:[%s2439_s21 + $0x3e0] sm:$0xff]  ;;  %v450_v8 = vld [vmem:[%s2431_s19 + $0x3e8] sm:$0xff] }
 0x108   : > { %1589 = vst [vmem:[%s2486_s24 + $0x380] sm:$0xff] %v1333_v25  ;;  %v1213_v25 = vld [vmem:[%s2447_s18 + $0x3c0] sm:$0xff] }
 0x109   : > { %4082 = vst [vmem:[#allocation99_spill] sm:$0xff] %v3274_v5  ;;  %v3302_v5 = vadd.f32 1.0, %v703_v49  ;;  %v958_v20 = vmul.f32 %v3295_v50, %v446_v19  ;;  %v1341_v28 = vadd.f32 %v1213_v25, %v957_v62  ;;  %v706_v19 = vld [vmem:[%s2439_s21 + $0x3e8] sm:$0xff]  ;;  %v451_v25 = vld [vmem:[%s2431_s19 + $0x3f0] sm:$0xff] }
 0x10a   : > { %1590 = vst [vmem:[%s2486_s24 + $0x388] sm:$0xff] %v1334_v37  ;;  %v1214_v37 = vld [vmem:[%s2447_s18 + $0x3c8] sm:$0xff] }
 0x10b   : > { %4083 = vst [vmem:[#allocation100_spill] sm:$0xff] %v3281_v36  ;;  %v3309_v36 = vadd.f32 1.0, %v704_v58  ;;  %v959_v49 = vmul.f32 %v3302_v5, %v447_v32  ;;  %v1342_v46 = vadd.f32 %v1214_v37, %v958_v20  ;;  %v707_v32 = vld [vmem:[%s2439_s21 + $0x3f0] sm:$0xff]  ;;  %v708_v37 = vld [vmem:[%s2439_s21 + $0x3f8] sm:$0xff] }
 0x10c   : > { %1591 = vst [vmem:[%s2486_s24 + $0x390] sm:$0xff] %v1335_v55  ;;  %v1215_v55 = vld [vmem:[%s2447_s18 + $0x3d0] sm:$0xff] }
 0x10d   : > { %4084 = vst [vmem:[#allocation101_spill] sm:$0xff] %v3288_v34  ;;  %v3316_v34 = vadd.f32 1.0, %v705_v6  ;;  %v960_v58 = vmul.f32 %v3309_v36, %v448_v44  ;;  %v1343_v62 = vadd.f32 %v1215_v55, %v959_v49  ;;  %v1220_v44 = vld [vmem:[%s2447_s18 + $0x3f8] sm:$0xff]  ;;  %v454_v55 = vld [vmem:[%s2431_s19 + $0x408] sm:$0xff] }
 0x10e   : > { %1592 = vst [vmem:[%s2486_s24 + $0x398] sm:$0xff] %v1336_v10  ;;  %v1216_v10 = vld [vmem:[%s2447_s18 + $0x3d8] sm:$0xff] }
 0x10f   : > { %4085 = vst [vmem:[#allocation102_spill] sm:$0xff] %v3295_v50  ;;  %v3323_v50 = vadd.f32 1.0, %v706_v19  ;;  %v961_v6 = vmul.f32 %v3316_v34, %v449_v57  ;;  %v1344_v20 = vadd.f32 %v1216_v10, %v960_v58  ;;  %v455_v57 = vld [vmem:[%s2431_s19 + $0x410] sm:$0xff]  ;;  %v456_v10 = vld [vmem:[%s2431_s19 + $0x418] sm:$0xff]  ;;  %v458_v58 = vld [vmem:[%s2431_s19 + $0x428] sm:$0xff] }
 0x110   : > { %1593 = vst [vmem:[%s2486_s24 + $0x3a0] sm:$0xff] %v1337_v27  ;;  %v1217_v27 = vld [vmem:[%s2447_s18 + $0x3e0] sm:$0xff] }
 0x111   : > { %4086 = vst [vmem:[#allocation103_spill] sm:$0xff] %v3302_v5  ;;  %v3330_v5 = vadd.f32 1.0, %v707_v32  ;;  %v962_v19 = vmul.f32 %v3323_v50, %v450_v8  ;;  %v965_v32 = vmul.f32 %v2450_v3, %v453_v18  ;;  %v457_v8 = vld [vmem:[%s2431_s19 + $0x420] sm:$0xff]  ;;  %v459_v3 = vld [vmem:[%s2431_s19 + $0x430] sm:$0xff] }
 0x112   : > { %1594 = vst [vmem:[%s2486_s24 + $0x3a8] sm:$0xff] %v1338_v42  ;;  %v1218_v42 = vld [vmem:[%s2447_s18 + $0x3e8] sm:$0xff]  ;;  %v2032_v18 = vld [vmem:[%s2447_s18] sm:$0xff] }
 0x113   : > { %4087 = vst [vmem:[#allocation104_spill] sm:$0xff] %v3309_v36  ;;  %v3337_v36 = vadd.f32 1.0, %v708_v37  ;;  %v963_v49 = vmul.f32 %v3330_v5, %v451_v25  ;;  %v1346_v37 = vadd.f32 %v1218_v42, %v962_v19  ;;  %v968_v25 = vmul.f32 %v2467_v17, %v456_v10  ;;  %v460_v42 = vld [vmem:[%s2431_s19 + $0x438] sm:$0xff]  ;;  %v461_v19 = vld [vmem:[%s2431_s19 + $0x440] sm:$0xff]  ;;  %v2037_v10 = vld [vmem:[%s2447_s18 + $0x28] sm:$0xff] }
 0x114   : > { %1595 = vst [vmem:[%s2486_s24 + $0x3b0] sm:$0xff] %v1339_v61  ;;  %v1219_v61 = vld [vmem:[%s2447_s18 + $0x3f0] sm:$0xff]  ;;  %v970_v17 = vmul.f32 %v2479_v29, %v458_v58 }
 0x115   : > { %1596 = vst [vmem:[%s2486_s24 + $0x3b8] sm:$0xff] %v1340_v15  ;;  %v452_v15 = vld [vmem:[%s2431_s19 + $0x3f8] sm:$0xff]  ;;  %v463_v29 = vld [vmem:[%s2431_s19 + $0x450] sm:$0xff] }
 0x116   : > { %4088 = vst [vmem:[#allocation105_spill] sm:$0xff] %v3323_v50  ;;  %v964_v50 = vmul.f32 %v3337_v36, %v452_v15 }
 0x117   : > { %1597 = vst [vmem:[%s2486_s24 + $0x3c0] sm:$0xff] %v1341_v28  ;;  %v1345_v28 = vadd.f32 %v1217_v27, %v961_v6  ;;  %v967_v27 = vmul.f32 %v2461_v12, %v455_v57  ;;  %v969_v6 = vmul.f32 %v2473_v23, %v457_v8  ;;  %v2033_v12 = vld [vmem:[%s2447_s18 + $0x8] sm:$0xff]  ;;  %v971_v57 = vmul.f32 %v2490_v35, %v459_v3  ;;  %v464_v35 = vld [vmem:[%s2431_s19 + $0x458] sm:$0xff] }
 0x118   : > { %1598 = vst [vmem:[%s2486_s24 + $0x3c8] sm:$0xff] %v1342_v46  ;;  %v966_v46 = vmul.f32 %v2455_v7, %v454_v55  ;;  %v1347_v7 = vadd.f32 %v1219_v61, %v963_v49  ;;  %v1348_v15 = vadd.f32 %v1220_v44, %v964_v50  ;;  %v2034_v61 = vld [vmem:[%s2447_s18 + $0x10] sm:$0xff]  ;;  %v462_v23 = vld [vmem:[%s2431_s19 + $0x448] sm:$0xff]  ;;  %v2035_v50 = vld [vmem:[%s2447_s18 + $0x18] sm:$0xff]  ;;  %v1354_v8 = vadd.f32 %v2037_v10, %v970_v17 }
 0x119   : > { %1599 = vst [vmem:[%s2486_s24 + $0x3d0] sm:$0xff] %v1343_v62  ;;  %v1349_v62 = vadd.f32 %v2032_v18, %v965_v32  ;;  %v1351_v55 = vadd.f32 %v2034_v61, %v967_v27  ;;  %v1352_v44 = vadd.f32 %v2035_v50, %v968_v25  ;;  %v2036_v49 = vld [vmem:[%s2447_s18 + $0x20] sm:$0xff]  ;;  %v974_v58 = vmul.f32 %v2511_v53, %v462_v23  ;;  %v2039_v3 = vld [vmem:[%s2447_s18 + $0x38] sm:$0xff]  ;;  %v467_v53 = vld [vmem:[%s2431_s19 + $0x470] sm:$0xff] }
 0x11a   : > { %1600 = vst [vmem:[%s2486_s24 + $0x3d8] sm:$0xff] %v1344_v20  ;;  %v1350_v20 = vadd.f32 %v2033_v12, %v966_v46  ;;  %v1353_v32 = vadd.f32 %v2036_v49, %v969_v6  ;;  %v973_v46 = vmul.f32 %v2504_v47, %v461_v19  ;;  %v975_v25 = vmul.f32 %v2518_v59, %v463_v29  ;;  %v466_v47 = vld [vmem:[%s2431_s19 + $0x468] sm:$0xff]  ;;  %v468_v59 = vld [vmem:[%s2431_s19 + $0x478] sm:$0xff]  ;;  %v2042_v17 = vld [vmem:[%s2447_s18 + $0x50] sm:$0xff] }
 0x11b   : > { %1601 = vst [vmem:[%s2486_s24 + $0x3e0] sm:$0xff] %v1345_v28  ;;  %v972_v28 = vmul.f32 %v2497_v41, %v460_v42  ;;  %v465_v41 = vld [vmem:[%s2431_s19 + $0x460] sm:$0xff]  ;;  %v976_v18 = vmul.f32 %v2525_v1, %v464_v35  ;;  %v979_v61 = vmul.f32 %v2546_v24, %v467_v53  ;;  %v980_v23 = vmul.f32 %v2553_v31, %v468_v59  ;;  %v472_v24 = vld [vmem:[%s2431_s19 + $0x498] sm:$0xff]  ;;  %v2045_v29 = vld [vmem:[%s2447_s18 + $0x68] sm:$0xff] }
 0x11c   : > { %1602 = vst [vmem:[%s2486_s24 + $0x3e8] sm:$0xff] %v1346_v37  ;;  %v2038_v37 = vld [vmem:[%s2447_s18 + $0x30] sm:$0xff]  ;;  %v977_v42 = vmul.f32 %v2532_v9, %v465_v41  ;;  %v469_v1 = vld [vmem:[%s2431_s19 + $0x480] sm:$0xff]  ;;  %v1359_v19 = vadd.f32 %v2042_v17, %v975_v25  ;;  %v470_v9 = vld [vmem:[%s2431_s19 + $0x488] sm:$0xff]  ;;  %v984_v41 = vmul.f32 %v2581_v60, %v472_v24 }
 0x11d   : > { %1603 = vst [vmem:[%s2486_s24 + $0x3f0] sm:$0xff] %v1347_v7  ;;  %v1355_v27 = vadd.f32 %v2038_v37, %v971_v57  ;;  %v1356_v7 = vadd.f32 %v2039_v3, %v972_v28  ;;  %v2044_v50 = vld [vmem:[%s2447_s18 + $0x60] sm:$0xff]  ;;  %v981_v28 = vmul.f32 %v2560_v38, %v469_v1  ;;  %v474_v38 = vld [vmem:[%s2431_s19 + $0x4a8] sm:$0xff] }
 0x11e   : > { %1604 = vst [vmem:[%s2486_s24 + $0x3f8] sm:$0xff] %v1348_v15  ;;  %v2041_v15 = vld [vmem:[%s2447_s18 + $0x48] sm:$0xff]  ;;  %v473_v31 = vld [vmem:[%s2431_s19 + $0x4a0] sm:$0xff] }
 0x11f   : > { %1605 = vst [vmem:[%s2486_s24 + $0x400] sm:$0xff] %v1349_v62  ;;  %v2040_v62 = vld [vmem:[%s2447_s18 + $0x40] sm:$0xff]  ;;  %v1358_v12 = vadd.f32 %v2041_v15, %v974_v58  ;;  %v985_v25 = vmul.f32 %v2588_v4, %v473_v31  ;;  %v478_v4 = vld [vmem:[%s2431_s19 + $0x4c8] sm:$0xff] }
 0x120   : > { %1606 = vst [vmem:[%s2486_s24 + $0x408] sm:$0xff] %v1350_v20  ;;  %v1357_v6 = vadd.f32 %v2040_v62, %v973_v46  ;;  %v978_v20 = vmul.f32 %v2539_v16, %v466_v47  ;;  %v471_v16 = vld [vmem:[%s2431_s19 + $0x490] sm:$0xff]  ;;  %v2048_v37 = vld [vmem:[%s2447_s18 + $0x80] sm:$0xff]  ;;  %v2049_v47 = vld [vmem:[%s2447_s18 + $0x88] sm:$0xff] }
 0x121   : > { %1607 = vst [vmem:[%s2486_s24 + $0x410] sm:$0xff] %v1351_v55  ;;  %v2043_v55 = vld [vmem:[%s2447_s18 + $0x58] sm:$0xff]  ;;  %v2046_v46 = vld [vmem:[%s2447_s18 + $0x70] sm:$0xff]  ;;  %v983_v10 = vmul.f32 %v2574_v52, %v471_v16  ;;  %v477_v60 = vld [vmem:[%s2431_s19 + $0x4c0] sm:$0xff] }
 0x122   : > { %1608 = vst [vmem:[%s2486_s24 + $0x418] sm:$0xff] %v1352_v44  ;;  %v1360_v57 = vadd.f32 %v2043_v55, %v976_v18  ;;  %v1361_v44 = vadd.f32 %v2044_v50, %v977_v42  ;;  %v1362_v49 = vadd.f32 %v2045_v29, %v978_v20  ;;  %v1363_v35 = vadd.f32 %v2046_v46, %v979_v61  ;;  %v476_v52 = vld [vmem:[%s2431_s19 + $0x4b8] sm:$0xff]  ;;  %v2050_v18 = vld [vmem:[%s2447_s18 + $0x90] sm:$0xff]  ;;  %v2052_v15 = vld [vmem:[%s2447_s18 + $0xa0] sm:$0xff] }
 0x123   : > { %1609 = vst [vmem:[%s2486_s24 + $0x420] sm:$0xff] %v1353_v32  ;;  %v982_v32 = vmul.f32 %v2567_v45, %v470_v9  ;;  %v475_v45 = vld [vmem:[%s2431_s19 + $0x4b0] sm:$0xff]  ;;  %v1367_v53 = vadd.f32 %v2050_v18, %v983_v10  ;;  %v988_v59 = vmul.f32 %v2609_v30, %v476_v52  ;;  %v989_v20 = vmul.f32 %v2616_v39, %v477_v60  ;;  %v2053_v1 = vld [vmem:[%s2447_s18 + $0xa8] sm:$0xff]  ;;  %v481_v30 = vld [vmem:[%s2431_s19 + $0x4e0] sm:$0xff] }
 0x124   : > { %1610 = vst [vmem:[%s2486_s24 + $0x428] sm:$0xff] %v1354_v8  ;;  %v2047_v8 = vld [vmem:[%s2447_s18 + $0x78] sm:$0xff]  ;;  %v987_v62 = vmul.f32 %v2602_v21, %v475_v45  ;;  %v2054_v61 = vld [vmem:[%s2447_s18 + $0xb0] sm:$0xff]  ;;  %v482_v39 = vld [vmem:[%s2431_s19 + $0x4e8] sm:$0xff] }
 0x125   : > { %1611 = vst [vmem:[%s2486_s24 + $0x430] sm:$0xff] %v1355_v27  ;;  %v1364_v58 = vadd.f32 %v2047_v8, %v980_v23  ;;  %v1365_v27 = vadd.f32 %v2048_v37, %v981_v28  ;;  %v1366_v3 = vadd.f32 %v2049_v47, %v982_v32  ;;  %v480_v21 = vld [vmem:[%s2431_s19 + $0x4d8] sm:$0xff]  ;;  %v2056_v50 = vld [vmem:[%s2447_s18 + $0xc0] sm:$0xff]  ;;  %v993_v28 = vmul.f32 %v2644_v11, %v481_v30  ;;  %v2057_v24 = vld [vmem:[%s2447_s18 + $0xc8] sm:$0xff] }
 0x126   : > { %1612 = vst [vmem:[%s2486_s24 + $0x438] sm:$0xff] %v1356_v7  ;;  %v986_v7 = vmul.f32 %v2595_v13, %v474_v38  ;;  %v479_v13 = vld [vmem:[%s2431_s19 + $0x4d0] sm:$0xff]  ;;  %v1371_v9 = vadd.f32 %v2054_v61, %v987_v62  ;;  %v992_v16 = vmul.f32 %v2637_v0, %v480_v21  ;;  %v485_v0 = vld [vmem:[%s2431_s19 + $0x500] sm:$0xff]  ;;  %v486_v11 = vld [vmem:[%s2431_s19 + $0x508] sm:$0xff] }
 0x127   : > { %1613 = vst [vmem:[%s2486_s24 + $0x440] sm:$0xff] %v1357_v6  ;;  %v2051_v6 = vld [vmem:[%s2447_s18 + $0x98] sm:$0xff]  ;;  %v991_v55 = vmul.f32 %v2630_v56, %v479_v13  ;;  %v2058_v32 = vld [vmem:[%s2447_s18 + $0xd0] sm:$0xff]  ;;  %v2060_v8 = vld [vmem:[%s2447_s18 + $0xe0] sm:$0xff] }
 0x128   : > { %1614 = vst [vmem:[%s2486_s24 + $0x448] sm:$0xff] %v1358_v12  ;;  %v1368_v42 = vadd.f32 %v2051_v6, %v984_v41  ;;  %v1369_v12 = vadd.f32 %v2052_v15, %v985_v25  ;;  %v1370_v17 = vadd.f32 %v2053_v1, %v986_v7  ;;  %v484_v56 = vld [vmem:[%s2431_s19 + $0x4f8] sm:$0xff]  ;;  %v997_v41 = vmul.f32 %v2672_v54, %v485_v0  ;;  %v2061_v45 = vld [vmem:[%s2447_s18 + $0xe8] sm:$0xff]  ;;  %v2062_v25 = vld [vmem:[%s2447_s18 + $0xf0] sm:$0xff] }
 0x129   : > { %1615 = vst [vmem:[%s2486_s24 + $0x450] sm:$0xff] %v1359_v19  ;;  %v990_v19 = vmul.f32 %v2623_v48, %v478_v4  ;;  %v483_v48 = vld [vmem:[%s2431_s19 + $0x4f0] sm:$0xff]  ;;  %v1375_v31 = vadd.f32 %v2058_v32, %v991_v55  ;;  %v996_v38 = vmul.f32 %v2665_v43, %v484_v56  ;;  %v489_v43 = vld [vmem:[%s2431_s19 + $0x520] sm:$0xff]  ;;  %v490_v54 = vld [vmem:[%s2431_s19 + $0x528] sm:$0xff] }
 0x12a   : > { %1616 = vst [vmem:[%s2486_s24 + $0x458] sm:$0xff] %v1360_v57  ;;  %v2055_v57 = vld [vmem:[%s2447_s18 + $0xb8] sm:$0xff]  ;;  %v995_v46 = vmul.f32 %v2658_v33, %v483_v48  ;;  %v2064_v18 = vld [vmem:[%s2447_s18 + $0x100] sm:$0xff]  ;;  %v1001_v62 = vmul.f32 %v2700_v40, %v489_v43  ;;  %v2065_v4 = vld [vmem:[%s2447_s18 + $0x108] sm:$0xff] }
 0x12b   : > { %1617 = vst [vmem:[%s2486_s24 + $0x460] sm:$0xff] %v1361_v44  ;;  %v1372_v23 = vadd.f32 %v2055_v57, %v988_v59  ;;  %v1373_v44 = vadd.f32 %v2056_v50, %v989_v20  ;;  %v1374_v29 = vadd.f32 %v2057_v24, %v990_v19  ;;  %v488_v33 = vld [vmem:[%s2431_s19 + $0x518] sm:$0xff]  ;;  %v2066_v59 = vld [vmem:[%s2447_s18 + $0x110] sm:$0xff]  ;;  %v494_v40 = vld [vmem:[%s2431_s19 + $0x548] sm:$0xff] }
 0x12c   : > { %1618 = vst [vmem:[%s2486_s24 + $0x468] sm:$0xff] %v1362_v49  ;;  %v994_v49 = vmul.f32 %v2651_v22, %v482_v39  ;;  %v487_v22 = vld [vmem:[%s2431_s19 + $0x510] sm:$0xff]  ;;  %v1379_v52 = vadd.f32 %v2062_v25, %v995_v46  ;;  %v1000_v60 = vmul.f32 %v2693_v26, %v488_v33  ;;  %v493_v26 = vld [vmem:[%s2431_s19 + $0x540] sm:$0xff]  ;;  %v4090_v30 = vld [vmem:[#allocation21_spill] sm:$0xff] }
 0x12d   : > { %1619 = vst [vmem:[%s2486_s24 + $0x470] sm:$0xff] %v1363_v35  ;;  %v2059_v35 = vld [vmem:[%s2447_s18 + $0xd8] sm:$0xff]  ;;  %v999_v47 = vmul.f32 %v2686_v14, %v487_v22  ;;  %v4089_v21 = vld [vmem:[#allocation20_spill] sm:$0xff]  ;;  %v1005_v61 = vmul.f32 %v4090_v30, %v493_v26  ;;  %v4091_v39 = vld [vmem:[#allocation22_spill] sm:$0xff] }
 0x12e   : > { %1620 = vst [vmem:[%s2486_s24 + $0x478] sm:$0xff] %v1364_v58  ;;  %v1376_v10 = vadd.f32 %v2059_v35, %v992_v16  ;;  %v1377_v58 = vadd.f32 %v2060_v8, %v993_v28  ;;  %v1378_v37 = vadd.f32 %v2061_v45, %v994_v49  ;;  %v492_v14 = vld [vmem:[%s2431_s19 + $0x538] sm:$0xff]  ;;  %v1006_v57 = vmul.f32 %v4091_v39, %v494_v40  ;;  %v2070_v16 = vld [vmem:[%s2447_s18 + $0x130] sm:$0xff]  ;;  %v498_v28 = vld [vmem:[%s2431_s19 + $0x568] sm:$0xff] }
 0x12f   : > { %1621 = vst [vmem:[%s2486_s24 + $0x480] sm:$0xff] %v1365_v27  ;;  %v998_v27 = vmul.f32 %v2679_v63, %v486_v11  ;;  %v491_v63 = vld [vmem:[%s2431_s19 + $0x530] sm:$0xff]  ;;  %v1383_v13 = vadd.f32 %v2066_v59, %v999_v47  ;;  %v1004_v1 = vmul.f32 %v4089_v21, %v492_v14  ;;  %v4092_v50 = vld [vmem:[#allocation23_spill] sm:$0xff]  ;;  %v2072_v32 = vld [vmem:[%s2447_s18 + $0x140] sm:$0xff] }
 0x130   : > { %1622 = vst [vmem:[%s2486_s24 + $0x488] sm:$0xff] %v1366_v3  ;;  %v2063_v3 = vld [vmem:[%s2447_s18 + $0xf8] sm:$0xff]  ;;  %v1003_v15 = vmul.f32 %v2714_v2, %v491_v63  ;;  %v499_v0 = vld [vmem:[%s2431_s19 + $0x570] sm:$0xff]  ;;  %v4094_v46 = vld [vmem:[#allocation25_spill] sm:$0xff] }
 0x131   : > { %1623 = vst [vmem:[%s2486_s24 + $0x490] sm:$0xff] %v1367_v53  ;;  %v1380_v7 = vadd.f32 %v2063_v3, %v996_v38  ;;  %v1381_v53 = vadd.f32 %v2064_v18, %v997_v41  ;;  %v1382_v6 = vadd.f32 %v2065_v4, %v998_v27  ;;  %v496_v2 = vld [vmem:[%s2431_s19 + $0x558] sm:$0xff]  ;;  %v4095_v22 = vld [vmem:[#allocation26_spill] sm:$0xff]  ;;  %v502_v27 = vld [vmem:[%s2431_s19 + $0x588] sm:$0xff] }
 0x132   : > { %1624 = vst [vmem:[%s2486_s24 + $0x498] sm:$0xff] %v1368_v42  ;;  %v1002_v42 = vmul.f32 %v2707_v51, %v490_v54  ;;  %v495_v51 = vld [vmem:[%s2431_s19 + $0x550] sm:$0xff]  ;;  %v1387_v48 = vadd.f32 %v2070_v16, %v1003_v15  ;;  %v2071_v56 = vld [vmem:[%s2447_s18 + $0x138] sm:$0xff]  ;;  %v1010_v8 = vmul.f32 %v4095_v22, %v498_v28  ;;  %v2076_v3 = vld [vmem:[%s2447_s18 + $0x160] sm:$0xff] }
 0x133   : > { %1625 = vst [vmem:[%s2486_s24 + $0x4a0] sm:$0xff] %v1369_v12  ;;  %v2067_v12 = vld [vmem:[%s2447_s18 + $0x118] sm:$0xff]  ;;  %v1388_v24 = vadd.f32 %v2071_v56, %v1004_v1  ;;  %v2074_v41 = vld [vmem:[%s2447_s18 + $0x150] sm:$0xff]  ;;  %v506_v15 = vld [vmem:[%s2431_s19 + $0x5a8] sm:$0xff] }
 0x134   : > { %1626 = vst [vmem:[%s2486_s24 + $0x4a8] sm:$0xff] %v1370_v17  ;;  %v1384_v20 = vadd.f32 %v2067_v12, %v1000_v60  ;;  %v2068_v17 = vld [vmem:[%s2447_s18 + $0x120] sm:$0xff]  ;;  %v500_v35 = vld [vmem:[%s2431_s19 + $0x578] sm:$0xff]  ;;  %v503_v54 = vld [vmem:[%s2431_s19 + $0x590] sm:$0xff] }
 0x135   : > { %1627 = vst [vmem:[%s2486_s24 + $0x4b0] sm:$0xff] %v1371_v9  ;;  %v1385_v19 = vadd.f32 %v2068_v17, %v1001_v62  ;;  %v2069_v9 = vld [vmem:[%s2447_s18 + $0x128] sm:$0xff]  ;;  %v4096_v45 = vld [vmem:[#allocation27_spill] sm:$0xff]  ;;  %v4099_v14 = vld [vmem:[#allocation30_spill] sm:$0xff] }
 0x136   : > { %1628 = vst [vmem:[%s2486_s24 + $0x4b8] sm:$0xff] %v1372_v23  ;;  %v1386_v55 = vadd.f32 %v2069_v9, %v1002_v42  ;;  %v497_v23 = vld [vmem:[%s2431_s19 + $0x560] sm:$0xff]  ;;  %v2075_v43 = vld [vmem:[%s2447_s18 + $0x158] sm:$0xff]  ;;  %v4098_v60 = vld [vmem:[#allocation29_spill] sm:$0xff]  ;;  %v1014_v4 = vmul.f32 %v4099_v14, %v502_v27 }
 0x137   : > { %1629 = vst [vmem:[%s2486_s24 + $0x4c0] sm:$0xff] %v1373_v44  ;;  %v1007_v44 = vmul.f32 %v4092_v50, %v495_v51  ;;  %v1009_v11 = vmul.f32 %v4094_v46, %v497_v23  ;;  %v504_v18 = vld [vmem:[%s2431_s19 + $0x598] sm:$0xff]  ;;  %v2078_v42 = vld [vmem:[%s2447_s18 + $0x170] sm:$0xff]  ;;  %v2080_v51 = vld [vmem:[%s2447_s18 + $0x180] sm:$0xff] }
 0x138   : > { %1630 = vst [vmem:[%s2486_s24 + $0x4c8] sm:$0xff] %v1374_v29  ;;  %v4093_v29 = vld [vmem:[#allocation24_spill] sm:$0xff]  ;;  %v4100_v59 = vld [vmem:[#allocation31_spill] sm:$0xff]  ;;  %v507_v1 = vld [vmem:[%s2431_s19 + $0x5b0] sm:$0xff] }
 0x139   : > { %1631 = vst [vmem:[%s2486_s24 + $0x4d0] sm:$0xff] %v1375_v31  ;;  %v1008_v49 = vmul.f32 %v4093_v29, %v496_v2  ;;  %v1389_v31 = vadd.f32 %v2072_v32, %v1005_v61  ;;  %v1391_v33 = vadd.f32 %v2074_v41, %v1007_v44  ;;  %v2079_v40 = vld [vmem:[%s2447_s18 + $0x178] sm:$0xff]  ;;  %v2081_v2 = vld [vmem:[%s2447_s18 + $0x188] sm:$0xff]  ;;  %v2082_v23 = vld [vmem:[%s2447_s18 + $0x190] sm:$0xff] }
 0x13a   : > { %1632 = vst [vmem:[%s2486_s24 + $0x4d8] sm:$0xff] %v1376_v10  ;;  %v2073_v10 = vld [vmem:[%s2447_s18 + $0x148] sm:$0xff]  ;;  %v508_v61 = vld [vmem:[%s2431_s19 + $0x5b8] sm:$0xff]  ;;  %v1398_v9 = vadd.f32 %v2081_v2, %v1014_v4  ;;  %v517_v4 = vld [vmem:[%s2431_s19 + $0x600] sm:$0xff] }
 0x13b   : > { %1633 = vst [vmem:[%s2486_s24 + $0x4e0] sm:$0xff] %v1377_v58  ;;  %v1390_v38 = vadd.f32 %v2073_v10, %v1006_v57  ;;  %v501_v58 = vld [vmem:[%s2431_s19 + $0x580] sm:$0xff]  ;;  %v1392_v25 = vadd.f32 %v2075_v43, %v1008_v49  ;;  %v510_v44 = vld [vmem:[%s2431_s19 + $0x5c8] sm:$0xff]  ;;  %v2083_v28 = vld [vmem:[%s2447_s18 + $0x198] sm:$0xff] }
 0x13c   : > { %1634 = vst [vmem:[%s2486_s24 + $0x4e8] sm:$0xff] %v1378_v37  ;;  %v1011_v37 = vmul.f32 %v4096_v45, %v499_v0  ;;  %v1013_v63 = vmul.f32 %v4098_v60, %v501_v58  ;;  %v509_v57 = vld [vmem:[%s2431_s19 + $0x5c0] sm:$0xff]  ;;  %v511_v49 = vld [vmem:[%s2431_s19 + $0x5d0] sm:$0xff]  ;;  %v2087_v27 = vld [vmem:[%s2447_s18 + $0x1b8] sm:$0xff] }
 0x13d   : > { %1635 = vst [vmem:[%s2486_s24 + $0x4f0] sm:$0xff] %v1379_v52  ;;  %v4097_v52 = vld [vmem:[#allocation28_spill] sm:$0xff]  ;;  %v2086_v58 = vld [vmem:[%s2447_s18 + $0x1b0] sm:$0xff] }
 0x13e   : > { %1636 = vst [vmem:[%s2486_s24 + $0x4f8] sm:$0xff] %v1380_v7  ;;  %v1012_v47 = vmul.f32 %v4097_v52, %v500_v35  ;;  %v1393_v7 = vadd.f32 %v2076_v3, %v1009_v11  ;;  %v1395_v26 = vadd.f32 %v2078_v42, %v1011_v37  ;;  %v1397_v17 = vadd.f32 %v2080_v51, %v1013_v63  ;;  %v2084_v0 = vld [vmem:[%s2447_s18 + $0x1a0] sm:$0xff]  ;;  %v512_v11 = vld [vmem:[%s2431_s19 + $0x5d8] sm:$0xff]  ;;  %v2085_v35 = vld [vmem:[%s2447_s18 + $0x1a8] sm:$0xff] }
 0x13f   : > { %1637 = vst [vmem:[%s2486_s24 + $0x500] sm:$0xff] %v1381_v53  ;;  %v2077_v53 = vld [vmem:[%s2447_s18 + $0x168] sm:$0xff]  ;;  %v516_v63 = vld [vmem:[%s2431_s19 + $0x5f8] sm:$0xff] }
 0x140   : > { %1638 = vst [vmem:[%s2486_s24 + $0x508] sm:$0xff] %v1382_v6  ;;  %v1394_v62 = vadd.f32 %v2077_v53, %v1010_v8  ;;  %v505_v6 = vld [vmem:[%s2431_s19 + $0x5a0] sm:$0xff]  ;;  %v1396_v12 = vadd.f32 %v2079_v40, %v1012_v47  ;;  %v514_v37 = vld [vmem:[%s2431_s19 + $0x5e8] sm:$0xff]  ;;  %v515_v47 = vld [vmem:[%s2431_s19 + $0x5f0] sm:$0xff] }
 0x141   : > { %1639 = vst [vmem:[%s2486_s24 + $0x510] sm:$0xff] %v1383_v13  ;;  %v1015_v13 = vmul.f32 %v4100_v59, %v503_v54  ;;  %v513_v8 = vld [vmem:[%s2431_s19 + $0x5e0] sm:$0xff] }
 0x142   : > { %1640 = vst [vmem:[%s2486_s24 + $0x518] sm:$0xff] %v1384_v20  ;;  %v4101_v20 = vld [vmem:[#allocation32_spill] sm:$0xff] }
 0x143   : > { %1641 = vst [vmem:[%s2486_s24 + $0x520] sm:$0xff] %v1385_v19  ;;  %v1016_v21 = vmul.f32 %v4101_v20, %v504_v18  ;;  %v4102_v19 = vld [vmem:[#allocation33_spill] sm:$0xff]  ;;  %v1399_v16 = vadd.f32 %v2082_v23, %v1015_v13  ;;  %v2088_v54 = vld [vmem:[%s2447_s18 + $0x1c0] sm:$0xff] }
 0x144   : > { %1642 = vst [vmem:[%s2486_s24 + $0x528] sm:$0xff] %v1386_v55  ;;  %v1017_v30 = vmul.f32 %v4102_v19, %v505_v6  ;;  %v4103_v55 = vld [vmem:[#allocation34_spill] sm:$0xff]  ;;  %v2089_v18 = vld [vmem:[%s2447_s18 + $0x1c8] sm:$0xff] }
 0x145   : > { %1643 = vst [vmem:[%s2486_s24 + $0x530] sm:$0xff] %v1387_v48  ;;  %v1018_v39 = vmul.f32 %v4103_v55, %v506_v15  ;;  %v4104_v48 = vld [vmem:[#allocation35_spill] sm:$0xff]  ;;  %v1400_v56 = vadd.f32 %v2083_v28, %v1016_v21  ;;  %v2090_v6 = vld [vmem:[%s2447_s18 + $0x1d0] sm:$0xff]  ;;  %v518_v13 = vld [vmem:[%s2431_s19 + $0x608] sm:$0xff] }
 0x146   : > { %1644 = vst [vmem:[%s2486_s24 + $0x538] sm:$0xff] %v1388_v24  ;;  %v1019_v50 = vmul.f32 %v4104_v48, %v507_v1  ;;  %v4105_v24 = vld [vmem:[#allocation36_spill] sm:$0xff]  ;;  %v1401_v32 = vadd.f32 %v2084_v0, %v1017_v30  ;;  %v2091_v15 = vld [vmem:[%s2447_s18 + $0x1d8] sm:$0xff]  ;;  %v519_v21 = vld [vmem:[%s2431_s19 + $0x610] sm:$0xff] }
 0x147   : > { %1645 = vst [vmem:[%s2486_s24 + $0x540] sm:$0xff] %v1389_v31  ;;  %v1020_v29 = vmul.f32 %v4105_v24, %v508_v61  ;;  %v4106_v31 = vld [vmem:[#allocation37_spill] sm:$0xff]  ;;  %v1402_v10 = vadd.f32 %v2085_v35, %v1018_v39  ;;  %v2092_v1 = vld [vmem:[%s2447_s18 + $0x1e0] sm:$0xff]  ;;  %v520_v30 = vld [vmem:[%s2431_s19 + $0x618] sm:$0xff] }
 0x148   : > { %1646 = vst [vmem:[%s2486_s24 + $0x548] sm:$0xff] %v1390_v38  ;;  %v1021_v46 = vmul.f32 %v4106_v31, %v509_v57  ;;  %v4107_v38 = vld [vmem:[#allocation38_spill] sm:$0xff]  ;;  %v1403_v41 = vadd.f32 %v2086_v58, %v1019_v50  ;;  %v2093_v61 = vld [vmem:[%s2447_s18 + $0x1e8] sm:$0xff]  ;;  %v521_v39 = vld [vmem:[%s2431_s19 + $0x620] sm:$0xff] }
 0x149   : > { %1647 = vst [vmem:[%s2486_s24 + $0x550] sm:$0xff] %v1391_v33  ;;  %v1022_v22 = vmul.f32 %v4107_v38, %v510_v44  ;;  %v4108_v33 = vld [vmem:[#allocation39_spill] sm:$0xff]  ;;  %v1404_v43 = vadd.f32 %v2087_v27, %v1020_v29  ;;  %v2094_v57 = vld [vmem:[%s2447_s18 + $0x1f0] sm:$0xff]  ;;  %v522_v50 = vld [vmem:[%s2431_s19 + $0x628] sm:$0xff] }
 0x14a   : > { %1648 = vst [vmem:[%s2486_s24 + $0x558] sm:$0xff] %v1392_v25  ;;  %v1023_v45 = vmul.f32 %v4108_v33, %v511_v49  ;;  %v4109_v25 = vld [vmem:[#allocation40_spill] sm:$0xff]  ;;  %v1405_v3 = vadd.f32 %v2088_v54, %v1021_v46  ;;  %v2095_v44 = vld [vmem:[%s2447_s18 + $0x1f8] sm:$0xff]  ;;  %v523_v29 = vld [vmem:[%s2431_s19 + $0x630] sm:$0xff] }
 0x14b   : > { %1649 = vst [vmem:[%s2486_s24 + $0x560] sm:$0xff] %v1393_v7  ;;  %v1024_v52 = vmul.f32 %v4109_v25, %v512_v11  ;;  %v4110_v7 = vld [vmem:[#allocation41_spill] sm:$0xff]  ;;  %v1406_v53 = vadd.f32 %v2089_v18, %v1022_v22  ;;  %v2096_v49 = vld [vmem:[%s2447_s18 + $0x200] sm:$0xff]  ;;  %v524_v46 = vld [vmem:[%s2431_s19 + $0x638] sm:$0xff] }
 0x14c   : > { %1650 = vst [vmem:[%s2486_s24 + $0x568] sm:$0xff] %v1394_v62  ;;  %v1025_v60 = vmul.f32 %v4110_v7, %v513_v8  ;;  %v4111_v62 = vld [vmem:[#allocation42_spill] sm:$0xff]  ;;  %v1407_v42 = vadd.f32 %v2090_v6, %v1023_v45  ;;  %v2097_v11 = vld [vmem:[%s2447_s18 + $0x208] sm:$0xff]  ;;  %v525_v22 = vld [vmem:[%s2431_s19 + $0x640] sm:$0xff] }
 0x14d   : > { %1651 = vst [vmem:[%s2486_s24 + $0x570] sm:$0xff] %v1395_v26  ;;  %v1026_v14 = vmul.f32 %v4111_v62, %v514_v37  ;;  %v4112_v26 = vld [vmem:[#allocation43_spill] sm:$0xff]  ;;  %v1408_v40 = vadd.f32 %v2091_v15, %v1024_v52  ;;  %v2098_v8 = vld [vmem:[%s2447_s18 + $0x210] sm:$0xff]  ;;  %v526_v45 = vld [vmem:[%s2431_s19 + $0x648] sm:$0xff] }
 0x14e   : > { %1652 = vst [vmem:[%s2486_s24 + $0x578] sm:$0xff] %v1396_v12  ;;  %v1027_v59 = vmul.f32 %v4112_v26, %v515_v47  ;;  %v4113_v12 = vld [vmem:[#allocation44_spill] sm:$0xff]  ;;  %v1409_v51 = vadd.f32 %v2092_v1, %v1025_v60  ;;  %v2099_v37 = vld [vmem:[%s2447_s18 + $0x218] sm:$0xff]  ;;  %v527_v52 = vld [vmem:[%s2431_s19 + $0x650] sm:$0xff] }
 0x14f   : > { %1653 = vst [vmem:[%s2486_s24 + $0x580] sm:$0xff] %v1397_v17  ;;  %v1028_v20 = vmul.f32 %v4113_v12, %v516_v63  ;;  %v4114_v17 = vld [vmem:[#allocation45_spill] sm:$0xff]  ;;  %v1410_v2 = vadd.f32 %v2093_v61, %v1026_v14  ;;  %v2100_v47 = vld [vmem:[%s2447_s18 + $0x220] sm:$0xff]  ;;  %v528_v60 = vld [vmem:[%s2431_s19 + $0x658] sm:$0xff] }
 0x150   : > { %1654 = vst [vmem:[%s2486_s24 + $0x588] sm:$0xff] %v1398_v9  ;;  %v1029_v19 = vmul.f32 %v4114_v17, %v517_v4  ;;  %v4115_v9 = vld [vmem:[#allocation46_spill] sm:$0xff]  ;;  %v1411_v23 = vadd.f32 %v2094_v57, %v1027_v59  ;;  %v2101_v63 = vld [vmem:[%s2447_s18 + $0x228] sm:$0xff]  ;;  %v529_v14 = vld [vmem:[%s2431_s19 + $0x660] sm:$0xff] }
 0x151   : > { %1655 = vst [vmem:[%s2486_s24 + $0x590] sm:$0xff] %v1399_v16  ;;  %v1030_v55 = vmul.f32 %v4115_v9, %v518_v13  ;;  %v4116_v16 = vld [vmem:[#allocation47_spill] sm:$0xff]  ;;  %v1412_v28 = vadd.f32 %v2095_v44, %v1028_v20  ;;  %v2102_v4 = vld [vmem:[%s2447_s18 + $0x230] sm:$0xff]  ;;  %v530_v59 = vld [vmem:[%s2431_s19 + $0x668] sm:$0xff] }
 0x152   : > { %1656 = vst [vmem:[%s2486_s24 + $0x598] sm:$0xff] %v1400_v56  ;;  %v1031_v48 = vmul.f32 %v4116_v16, %v519_v21  ;;  %v4117_v56 = vld [vmem:[#allocation48_spill] sm:$0xff]  ;;  %v1413_v0 = vadd.f32 %v2096_v49, %v1029_v19  ;;  %v2103_v13 = vld [vmem:[%s2447_s18 + $0x238] sm:$0xff]  ;;  %v531_v20 = vld [vmem:[%s2431_s19 + $0x670] sm:$0xff] }
 0x153   : > { %1657 = vst [vmem:[%s2486_s24 + $0x5a0] sm:$0xff] %v1401_v32  ;;  %v1032_v24 = vmul.f32 %v4117_v56, %v520_v30  ;;  %v4118_v32 = vld [vmem:[#allocation49_spill] sm:$0xff]  ;;  %v1414_v35 = vadd.f32 %v2097_v11, %v1030_v55  ;;  %v2104_v21 = vld [vmem:[%s2447_s18 + $0x240] sm:$0xff]  ;;  %v532_v19 = vld [vmem:[%s2431_s19 + $0x678] sm:$0xff] }
 0x154   : > { %1658 = vst [vmem:[%s2486_s24 + $0x5a8] sm:$0xff] %v1402_v10  ;;  %v1033_v31 = vmul.f32 %v4118_v32, %v521_v39  ;;  %v4119_v10 = vld [vmem:[#allocation50_spill] sm:$0xff]  ;;  %v1415_v58 = vadd.f32 %v2098_v8, %v1031_v48  ;;  %v2105_v30 = vld [vmem:[%s2447_s18 + $0x248] sm:$0xff]  ;;  %v533_v55 = vld [vmem:[%s2431_s19 + $0x680] sm:$0xff] }
 0x155   : > { %1659 = vst [vmem:[%s2486_s24 + $0x5b0] sm:$0xff] %v1403_v41  ;;  %v1034_v38 = vmul.f32 %v4119_v10, %v522_v50  ;;  %v4120_v41 = vld [vmem:[#allocation51_spill] sm:$0xff]  ;;  %v1416_v27 = vadd.f32 %v2099_v37, %v1032_v24  ;;  %v2106_v39 = vld [vmem:[%s2447_s18 + $0x250] sm:$0xff]  ;;  %v534_v48 = vld [vmem:[%s2431_s19 + $0x688] sm:$0xff] }
 0x156   : > { %1660 = vst [vmem:[%s2486_s24 + $0x5b8] sm:$0xff] %v1404_v43  ;;  %v1035_v33 = vmul.f32 %v4120_v41, %v523_v29  ;;  %v4121_v43 = vld [vmem:[#allocation52_spill] sm:$0xff]  ;;  %v1417_v54 = vadd.f32 %v2100_v47, %v1033_v31  ;;  %v2107_v50 = vld [vmem:[%s2447_s18 + $0x258] sm:$0xff]  ;;  %v535_v24 = vld [vmem:[%s2431_s19 + $0x690] sm:$0xff] }
 0x157   : > { %1661 = vst [vmem:[%s2486_s24 + $0x5c0] sm:$0xff] %v1405_v3  ;;  %v1036_v25 = vmul.f32 %v4121_v43, %v524_v46  ;;  %v4122_v3 = vld [vmem:[#allocation53_spill] sm:$0xff]  ;;  %v1418_v18 = vadd.f32 %v2101_v63, %v1034_v38  ;;  %v2108_v29 = vld [vmem:[%s2447_s18 + $0x260] sm:$0xff]  ;;  %v536_v31 = vld [vmem:[%s2431_s19 + $0x698] sm:$0xff] }
 0x158   : > { %1662 = vst [vmem:[%s2486_s24 + $0x5c8] sm:$0xff] %v1406_v53  ;;  %v1037_v7 = vmul.f32 %v4122_v3, %v525_v22  ;;  %v4123_v53 = vld [vmem:[#allocation54_spill] sm:$0xff]  ;;  %v1419_v6 = vadd.f32 %v2102_v4, %v1035_v33  ;;  %v2109_v46 = vld [vmem:[%s2447_s18 + $0x268] sm:$0xff]  ;;  %v537_v38 = vld [vmem:[%s2431_s19 + $0x6a0] sm:$0xff] }
 0x159   : > { %1663 = vst [vmem:[%s2486_s24 + $0x5d0] sm:$0xff] %v1407_v42  ;;  %v1038_v62 = vmul.f32 %v4123_v53, %v526_v45  ;;  %v4124_v42 = vld [vmem:[#allocation55_spill] sm:$0xff]  ;;  %v1420_v15 = vadd.f32 %v2103_v13, %v1036_v25  ;;  %v2110_v22 = vld [vmem:[%s2447_s18 + $0x270] sm:$0xff]  ;;  %v538_v33 = vld [vmem:[%s2431_s19 + $0x6a8] sm:$0xff] }
 0x15a   : > { %1664 = vst [vmem:[%s2486_s24 + $0x5d8] sm:$0xff] %v1408_v40  ;;  %v1039_v26 = vmul.f32 %v4124_v42, %v527_v52  ;;  %v4125_v40 = vld [vmem:[#allocation56_spill] sm:$0xff]  ;;  %v1421_v1 = vadd.f32 %v2104_v21, %v1037_v7  ;;  %v2111_v45 = vld [vmem:[%s2447_s18 + $0x278] sm:$0xff]  ;;  %v539_v25 = vld [vmem:[%s2431_s19 + $0x6b0] sm:$0xff] }
 0x15b   : > { %1665 = vst [vmem:[%s2486_s24 + $0x5e0] sm:$0xff] %v1409_v51  ;;  %v1040_v12 = vmul.f32 %v4125_v40, %v528_v60  ;;  %v4126_v51 = vld [vmem:[#allocation57_spill] sm:$0xff]  ;;  %v1422_v61 = vadd.f32 %v2105_v30, %v1038_v62  ;;  %v2112_v52 = vld [vmem:[%s2447_s18 + $0x280] sm:$0xff]  ;;  %v540_v7 = vld [vmem:[%s2431_s19 + $0x6b8] sm:$0xff] }
 0x15c   : > { %1666 = vst [vmem:[%s2486_s24 + $0x5e8] sm:$0xff] %v1410_v2  ;;  %v1041_v17 = vmul.f32 %v4126_v51, %v529_v14  ;;  %v4127_v2 = vld [vmem:[#allocation58_spill] sm:$0xff]  ;;  %v1423_v57 = vadd.f32 %v2106_v39, %v1039_v26  ;;  %v2113_v60 = vld [vmem:[%s2447_s18 + $0x288] sm:$0xff]  ;;  %v541_v62 = vld [vmem:[%s2431_s19 + $0x6c0] sm:$0xff] }
 0x15d   : > { %1667 = vst [vmem:[%s2486_s24 + $0x5f0] sm:$0xff] %v1411_v23  ;;  %v1042_v9 = vmul.f32 %v4127_v2, %v530_v59  ;;  %v4128_v23 = vld [vmem:[#allocation59_spill] sm:$0xff]  ;;  %v1424_v44 = vadd.f32 %v2107_v50, %v1040_v12  ;;  %v2114_v14 = vld [vmem:[%s2447_s18 + $0x290] sm:$0xff]  ;;  %v542_v26 = vld [vmem:[%s2431_s19 + $0x6c8] sm:$0xff] }
 0x15e   : > { %1668 = vst [vmem:[%s2486_s24 + $0x5f8] sm:$0xff] %v1412_v28  ;;  %v1043_v16 = vmul.f32 %v4128_v23, %v531_v20  ;;  %v4129_v28 = vld [vmem:[#allocation60_spill] sm:$0xff]  ;;  %v1425_v49 = vadd.f32 %v2108_v29, %v1041_v17  ;;  %v2115_v59 = vld [vmem:[%s2447_s18 + $0x298] sm:$0xff]  ;;  %v543_v12 = vld [vmem:[%s2431_s19 + $0x6d0] sm:$0xff] }
 0x15f   : > { %1669 = vst [vmem:[%s2486_s24 + $0x600] sm:$0xff] %v1413_v0  ;;  %v1044_v56 = vmul.f32 %v4129_v28, %v532_v19  ;;  %v4130_v0 = vld [vmem:[#allocation61_spill] sm:$0xff]  ;;  %v1426_v11 = vadd.f32 %v2109_v46, %v1042_v9  ;;  %v2116_v20 = vld [vmem:[%s2447_s18 + $0x2a0] sm:$0xff]  ;;  %v544_v17 = vld [vmem:[%s2431_s19 + $0x6d8] sm:$0xff] }
 0x160   : > { %1670 = vst [vmem:[%s2486_s24 + $0x608] sm:$0xff] %v1414_v35  ;;  %v1045_v32 = vmul.f32 %v4130_v0, %v533_v55  ;;  %v4131_v35 = vld [vmem:[#allocation62_spill] sm:$0xff]  ;;  %v1427_v8 = vadd.f32 %v2110_v22, %v1043_v16  ;;  %v2117_v19 = vld [vmem:[%s2447_s18 + $0x2a8] sm:$0xff]  ;;  %v545_v9 = vld [vmem:[%s2431_s19 + $0x6e0] sm:$0xff] }
 0x161   : > { %1671 = vst [vmem:[%s2486_s24 + $0x610] sm:$0xff] %v1415_v58  ;;  %v1046_v10 = vmul.f32 %v4131_v35, %v534_v48  ;;  %v4132_v58 = vld [vmem:[#allocation63_spill] sm:$0xff]  ;;  %v1428_v37 = vadd.f32 %v2111_v45, %v1044_v56  ;;  %v2118_v55 = vld [vmem:[%s2447_s18 + $0x2b0] sm:$0xff]  ;;  %v546_v16 = vld [vmem:[%s2431_s19 + $0x6e8] sm:$0xff] }
 0x162   : > { %1672 = vst [vmem:[%s2486_s24 + $0x618] sm:$0xff] %v1416_v27  ;;  %v1047_v41 = vmul.f32 %v4132_v58, %v535_v24  ;;  %v4133_v27 = vld [vmem:[#allocation64_spill] sm:$0xff]  ;;  %v1429_v47 = vadd.f32 %v2112_v52, %v1045_v32  ;;  %v2119_v48 = vld [vmem:[%s2447_s18 + $0x2b8] sm:$0xff]  ;;  %v547_v56 = vld [vmem:[%s2431_s19 + $0x6f0] sm:$0xff] }
 0x163   : > { %1673 = vst [vmem:[%s2486_s24 + $0x620] sm:$0xff] %v1417_v54  ;;  %v1048_v43 = vmul.f32 %v4133_v27, %v536_v31  ;;  %v4134_v54 = vld [vmem:[#allocation65_spill] sm:$0xff]  ;;  %v1430_v63 = vadd.f32 %v2113_v60, %v1046_v10  ;;  %v2120_v24 = vld [vmem:[%s2447_s18 + $0x2c0] sm:$0xff]  ;;  %v548_v32 = vld [vmem:[%s2431_s19 + $0x6f8] sm:$0xff] }
 0x164   : > { %1674 = vst [vmem:[%s2486_s24 + $0x628] sm:$0xff] %v1418_v18  ;;  %v1049_v3 = vmul.f32 %v4134_v54, %v537_v38  ;;  %v4135_v18 = vld [vmem:[#allocation66_spill] sm:$0xff]  ;;  %v1431_v4 = vadd.f32 %v2114_v14, %v1047_v41  ;;  %v2121_v31 = vld [vmem:[%s2447_s18 + $0x2c8] sm:$0xff]  ;;  %v549_v10 = vld [vmem:[%s2431_s19 + $0x700] sm:$0xff] }
 0x165   : > { %1675 = vst [vmem:[%s2486_s24 + $0x630] sm:$0xff] %v1419_v6  ;;  %v1050_v53 = vmul.f32 %v4135_v18, %v538_v33  ;;  %v4136_v6 = vld [vmem:[#allocation67_spill] sm:$0xff]  ;;  %v1432_v13 = vadd.f32 %v2115_v59, %v1048_v43  ;;  %v2122_v38 = vld [vmem:[%s2447_s18 + $0x2d0] sm:$0xff]  ;;  %v550_v41 = vld [vmem:[%s2431_s19 + $0x708] sm:$0xff] }
 0x166   : > { %1676 = vst [vmem:[%s2486_s24 + $0x638] sm:$0xff] %v1420_v15  ;;  %v1051_v42 = vmul.f32 %v4136_v6, %v539_v25  ;;  %v4137_v15 = vld [vmem:[#allocation68_spill] sm:$0xff]  ;;  %v1433_v21 = vadd.f32 %v2116_v20, %v1049_v3  ;;  %v2123_v33 = vld [vmem:[%s2447_s18 + $0x2d8] sm:$0xff]  ;;  %v551_v43 = vld [vmem:[%s2431_s19 + $0x710] sm:$0xff] }
 0x167   : > { %1677 = vst [vmem:[%s2486_s24 + $0x640] sm:$0xff] %v1421_v1  ;;  %v1052_v40 = vmul.f32 %v4137_v15, %v540_v7  ;;  %v4138_v1 = vld [vmem:[#allocation69_spill] sm:$0xff]  ;;  %v1434_v30 = vadd.f32 %v2117_v19, %v1050_v53  ;;  %v2124_v25 = vld [vmem:[%s2447_s18 + $0x2e0] sm:$0xff]  ;;  %v552_v3 = vld [vmem:[%s2431_s19 + $0x718] sm:$0xff] }
 0x168   : > { %1678 = vst [vmem:[%s2486_s24 + $0x648] sm:$0xff] %v1422_v61  ;;  %v1053_v51 = vmul.f32 %v4138_v1, %v541_v62  ;;  %v4139_v61 = vld [vmem:[#allocation70_spill] sm:$0xff]  ;;  %v1435_v39 = vadd.f32 %v2118_v55, %v1051_v42  ;;  %v2125_v7 = vld [vmem:[%s2447_s18 + $0x2e8] sm:$0xff]  ;;  %v553_v53 = vld [vmem:[%s2431_s19 + $0x720] sm:$0xff] }
 0x169   : > { %1679 = vst [vmem:[%s2486_s24 + $0x650] sm:$0xff] %v1423_v57  ;;  %v1054_v2 = vmul.f32 %v4139_v61, %v542_v26  ;;  %v4140_v57 = vld [vmem:[#allocation71_spill] sm:$0xff]  ;;  %v1436_v50 = vadd.f32 %v2119_v48, %v1052_v40  ;;  %v2126_v62 = vld [vmem:[%s2447_s18 + $0x2f0] sm:$0xff]  ;;  %v554_v42 = vld [vmem:[%s2431_s19 + $0x728] sm:$0xff] }
 0x16a   : > { %1680 = vst [vmem:[%s2486_s24 + $0x658] sm:$0xff] %v1424_v44  ;;  %v1055_v23 = vmul.f32 %v4140_v57, %v543_v12  ;;  %v4141_v44 = vld [vmem:[#allocation72_spill] sm:$0xff]  ;;  %v1437_v29 = vadd.f32 %v2120_v24, %v1053_v51  ;;  %v2127_v26 = vld [vmem:[%s2447_s18 + $0x2f8] sm:$0xff]  ;;  %v555_v40 = vld [vmem:[%s2431_s19 + $0x730] sm:$0xff] }
 0x16b   : > { %1681 = vst [vmem:[%s2486_s24 + $0x660] sm:$0xff] %v1425_v49  ;;  %v1056_v28 = vmul.f32 %v4141_v44, %v544_v17  ;;  %v4142_v49 = vld [vmem:[#allocation73_spill] sm:$0xff]  ;;  %v1438_v46 = vadd.f32 %v2121_v31, %v1054_v2  ;;  %v2128_v12 = vld [vmem:[%s2447_s18 + $0x300] sm:$0xff]  ;;  %v556_v51 = vld [vmem:[%s2431_s19 + $0x738] sm:$0xff] }
 0x16c   : > { %1682 = vst [vmem:[%s2486_s24 + $0x668] sm:$0xff] %v1426_v11  ;;  %v1057_v0 = vmul.f32 %v4142_v49, %v545_v9  ;;  %v4143_v11 = vld [vmem:[#allocation74_spill] sm:$0xff]  ;;  %v1439_v22 = vadd.f32 %v2122_v38, %v1055_v23  ;;  %v2129_v17 = vld [vmem:[%s2447_s18 + $0x308] sm:$0xff]  ;;  %v557_v2 = vld [vmem:[%s2431_s19 + $0x740] sm:$0xff] }
 0x16d   : > { %1683 = vst [vmem:[%s2486_s24 + $0x670] sm:$0xff] %v1427_v8  ;;  %v1058_v35 = vmul.f32 %v4143_v11, %v546_v16  ;;  %v4144_v8 = vld [vmem:[#allocation75_spill] sm:$0xff]  ;;  %v1440_v45 = vadd.f32 %v2123_v33, %v1056_v28  ;;  %v2130_v9 = vld [vmem:[%s2447_s18 + $0x310] sm:$0xff]  ;;  %v558_v23 = vld [vmem:[%s2431_s19 + $0x748] sm:$0xff] }
 0x16e   : > { %1684 = vst [vmem:[%s2486_s24 + $0x678] sm:$0xff] %v1428_v37  ;;  %v1059_v58 = vmul.f32 %v4144_v8, %v547_v56  ;;  %v4145_v37 = vld [vmem:[#allocation76_spill] sm:$0xff]  ;;  %v1441_v52 = vadd.f32 %v2124_v25, %v1057_v0  ;;  %v2131_v16 = vld [vmem:[%s2447_s18 + $0x318] sm:$0xff]  ;;  %v559_v28 = vld [vmem:[%s2431_s19 + $0x750] sm:$0xff] }
 0x16f   : > { %1685 = vst [vmem:[%s2486_s24 + $0x680] sm:$0xff] %v1429_v47  ;;  %v1060_v27 = vmul.f32 %v4145_v37, %v548_v32  ;;  %v4146_v47 = vld [vmem:[#allocation77_spill] sm:$0xff]  ;;  %v1442_v60 = vadd.f32 %v2125_v7, %v1058_v35  ;;  %v2132_v56 = vld [vmem:[%s2447_s18 + $0x320] sm:$0xff]  ;;  %v560_v0 = vld [vmem:[%s2431_s19 + $0x758] sm:$0xff] }
 0x170   : > { %1686 = vst [vmem:[%s2486_s24 + $0x688] sm:$0xff] %v1430_v63  ;;  %v1061_v54 = vmul.f32 %v4146_v47, %v549_v10  ;;  %v4147_v63 = vld [vmem:[#allocation78_spill] sm:$0xff]  ;;  %v1443_v14 = vadd.f32 %v2126_v62, %v1059_v58  ;;  %v2133_v32 = vld [vmem:[%s2447_s18 + $0x328] sm:$0xff]  ;;  %v561_v35 = vld [vmem:[%s2431_s19 + $0x760] sm:$0xff] }
 0x171   : > { %1687 = vst [vmem:[%s2486_s24 + $0x690] sm:$0xff] %v1431_v4  ;;  %v1062_v18 = vmul.f32 %v4147_v63, %v550_v41  ;;  %v4148_v4 = vld [vmem:[#allocation79_spill] sm:$0xff]  ;;  %v1444_v59 = vadd.f32 %v2127_v26, %v1060_v27  ;;  %v2134_v10 = vld [vmem:[%s2447_s18 + $0x330] sm:$0xff]  ;;  %v562_v58 = vld [vmem:[%s2431_s19 + $0x768] sm:$0xff] }
 0x172   : > { %1688 = vst [vmem:[%s2486_s24 + $0x698] sm:$0xff] %v1432_v13  ;;  %v1063_v6 = vmul.f32 %v4148_v4, %v551_v43  ;;  %v4149_v13 = vld [vmem:[#allocation80_spill] sm:$0xff]  ;;  %v1445_v20 = vadd.f32 %v2128_v12, %v1061_v54  ;;  %v2135_v41 = vld [vmem:[%s2447_s18 + $0x338] sm:$0xff]  ;;  %v563_v27 = vld [vmem:[%s2431_s19 + $0x770] sm:$0xff] }
 0x173   : > { %1689 = vst [vmem:[%s2486_s24 + $0x6a0] sm:$0xff] %v1433_v21  ;;  %v1064_v15 = vmul.f32 %v4149_v13, %v552_v3  ;;  %v4150_v21 = vld [vmem:[#allocation81_spill] sm:$0xff]  ;;  %v1446_v19 = vadd.f32 %v2129_v17, %v1062_v18  ;;  %v2136_v43 = vld [vmem:[%s2447_s18 + $0x340] sm:$0xff]  ;;  %v564_v54 = vld [vmem:[%s2431_s19 + $0x778] sm:$0xff] }
 0x174   : > { %1690 = vst [vmem:[%s2486_s24 + $0x6a8] sm:$0xff] %v1434_v30  ;;  %v1065_v1 = vmul.f32 %v4150_v21, %v553_v53  ;;  %v4151_v30 = vld [vmem:[#allocation82_spill] sm:$0xff]  ;;  %v1447_v55 = vadd.f32 %v2130_v9, %v1063_v6  ;;  %v2137_v3 = vld [vmem:[%s2447_s18 + $0x348] sm:$0xff]  ;;  %v565_v18 = vld [vmem:[%s2431_s19 + $0x780] sm:$0xff] }
 0x175   : > { %1691 = vst [vmem:[%s2486_s24 + $0x6b0] sm:$0xff] %v1435_v39  ;;  %v1066_v61 = vmul.f32 %v4151_v30, %v554_v42  ;;  %v4152_v39 = vld [vmem:[#allocation83_spill] sm:$0xff]  ;;  %v1448_v48 = vadd.f32 %v2131_v16, %v1064_v15  ;;  %v2138_v53 = vld [vmem:[%s2447_s18 + $0x350] sm:$0xff]  ;;  %v566_v6 = vld [vmem:[%s2431_s19 + $0x788] sm:$0xff] }
 0x176   : > { %1692 = vst [vmem:[%s2486_s24 + $0x6b8] sm:$0xff] %v1436_v50  ;;  %v1067_v57 = vmul.f32 %v4152_v39, %v555_v40  ;;  %v4153_v50 = vld [vmem:[#allocation84_spill] sm:$0xff]  ;;  %v1449_v24 = vadd.f32 %v2132_v56, %v1065_v1  ;;  %v2139_v42 = vld [vmem:[%s2447_s18 + $0x358] sm:$0xff]  ;;  %v567_v15 = vld [vmem:[%s2431_s19 + $0x790] sm:$0xff] }
 0x177   : > { %1693 = vst [vmem:[%s2486_s24 + $0x6c0] sm:$0xff] %v1437_v29  ;;  %v1068_v44 = vmul.f32 %v4153_v50, %v556_v51  ;;  %v4154_v29 = vld [vmem:[#allocation85_spill] sm:$0xff]  ;;  %v1450_v31 = vadd.f32 %v2133_v32, %v1066_v61  ;;  %v2140_v40 = vld [vmem:[%s2447_s18 + $0x360] sm:$0xff]  ;;  %v568_v1 = vld [vmem:[%s2431_s19 + $0x798] sm:$0xff] }
 0x178   : > { %1694 = vst [vmem:[%s2486_s24 + $0x6c8] sm:$0xff] %v1438_v46  ;;  %v1069_v49 = vmul.f32 %v4154_v29, %v557_v2  ;;  %v4155_v46 = vld [vmem:[#allocation86_spill] sm:$0xff]  ;;  %v1451_v38 = vadd.f32 %v2134_v10, %v1067_v57  ;;  %v2141_v51 = vld [vmem:[%s2447_s18 + $0x368] sm:$0xff]  ;;  %v569_v61 = vld [vmem:[%s2431_s19 + $0x7a0] sm:$0xff] }
 0x179   : > { %1695 = vst [vmem:[%s2486_s24 + $0x6d0] sm:$0xff] %v1439_v22  ;;  %v1070_v11 = vmul.f32 %v4155_v46, %v558_v23  ;;  %v4156_v22 = vld [vmem:[#allocation87_spill] sm:$0xff]  ;;  %v1452_v33 = vadd.f32 %v2135_v41, %v1068_v44  ;;  %v2142_v2 = vld [vmem:[%s2447_s18 + $0x370] sm:$0xff]  ;;  %v570_v57 = vld [vmem:[%s2431_s19 + $0x7a8] sm:$0xff] }
 0x17a   : > { %1696 = vst [vmem:[%s2486_s24 + $0x6d8] sm:$0xff] %v1440_v45  ;;  %v1071_v8 = vmul.f32 %v4156_v22, %v559_v28  ;;  %v4157_v45 = vld [vmem:[#allocation88_spill] sm:$0xff]  ;;  %v1453_v25 = vadd.f32 %v2136_v43, %v1069_v49  ;;  %v2143_v23 = vld [vmem:[%s2447_s18 + $0x378] sm:$0xff]  ;;  %v571_v44 = vld [vmem:[%s2431_s19 + $0x7b0] sm:$0xff] }
 0x17b   : > { %1697 = vst [vmem:[%s2486_s24 + $0x6e0] sm:$0xff] %v1441_v52  ;;  %v1072_v37 = vmul.f32 %v4157_v45, %v560_v0  ;;  %v4158_v52 = vld [vmem:[#allocation89_spill] sm:$0xff]  ;;  %v1454_v7 = vadd.f32 %v2137_v3, %v1070_v11  ;;  %v2144_v28 = vld [vmem:[%s2447_s18 + $0x380] sm:$0xff]  ;;  %v572_v49 = vld [vmem:[%s2431_s19 + $0x7b8] sm:$0xff] }
 0x17c   : > { %1698 = vst [vmem:[%s2486_s24 + $0x6e8] sm:$0xff] %v1442_v60  ;;  %v1073_v47 = vmul.f32 %v4158_v52, %v561_v35  ;;  %v4159_v60 = vld [vmem:[#allocation90_spill] sm:$0xff]  ;;  %v1455_v62 = vadd.f32 %v2138_v53, %v1071_v8  ;;  %v2145_v0 = vld [vmem:[%s2447_s18 + $0x388] sm:$0xff]  ;;  %v573_v11 = vld [vmem:[%s2431_s19 + $0x7c0] sm:$0xff] }
 0x17d   : > { %1699 = vst [vmem:[%s2486_s24 + $0x6f0] sm:$0xff] %v1443_v14  ;;  %v1074_v63 = vmul.f32 %v4159_v60, %v562_v58  ;;  %v4160_v14 = vld [vmem:[#allocation91_spill] sm:$0xff]  ;;  %v1456_v26 = vadd.f32 %v2139_v42, %v1072_v37  ;;  %v2146_v35 = vld [vmem:[%s2447_s18 + $0x390] sm:$0xff]  ;;  %v574_v8 = vld [vmem:[%s2431_s19 + $0x7c8] sm:$0xff] }
 0x17e   : > { %1700 = vst [vmem:[%s2486_s24 + $0x6f8] sm:$0xff] %v1444_v59  ;;  %v1075_v4 = vmul.f32 %v4160_v14, %v563_v27  ;;  %v4161_v59 = vld [vmem:[#allocation92_spill] sm:$0xff]  ;;  %v1457_v12 = vadd.f32 %v2140_v40, %v1073_v47  ;;  %v2147_v58 = vld [vmem:[%s2447_s18 + $0x398] sm:$0xff]  ;;  %v575_v37 = vld [vmem:[%s2431_s19 + $0x7d0] sm:$0xff] }
 0x17f   : > { %1701 = vst [vmem:[%s2486_s24 + $0x700] sm:$0xff] %v1445_v20  ;;  %v1076_v13 = vmul.f32 %v4161_v59, %v564_v54  ;;  %v4162_v20 = vld [vmem:[#allocation93_spill] sm:$0xff]  ;;  %v1458_v17 = vadd.f32 %v2141_v51, %v1074_v63  ;;  %v2148_v27 = vld [vmem:[%s2447_s18 + $0x3a0] sm:$0xff]  ;;  %v576_v47 = vld [vmem:[%s2431_s19 + $0x7d8] sm:$0xff] }
 0x180   : > { %1702 = vst [vmem:[%s2486_s24 + $0x708] sm:$0xff] %v1446_v19  ;;  %v1077_v21 = vmul.f32 %v4162_v20, %v565_v18  ;;  %v4163_v19 = vld [vmem:[#allocation94_spill] sm:$0xff]  ;;  %v1459_v9 = vadd.f32 %v2142_v2, %v1075_v4  ;;  %v2149_v54 = vld [vmem:[%s2447_s18 + $0x3a8] sm:$0xff]  ;;  %v577_v63 = vld [vmem:[%s2431_s19 + $0x7e0] sm:$0xff] }
 0x181   : > { %1703 = vst [vmem:[%s2486_s24 + $0x710] sm:$0xff] %v1447_v55  ;;  %v1078_v30 = vmul.f32 %v4163_v19, %v566_v6  ;;  %v4164_v55 = vld [vmem:[#allocation95_spill] sm:$0xff]  ;;  %v1460_v16 = vadd.f32 %v2143_v23, %v1076_v13  ;;  %v2150_v18 = vld [vmem:[%s2447_s18 + $0x3b0] sm:$0xff]  ;;  %v578_v4 = vld [vmem:[%s2431_s19 + $0x7e8] sm:$0xff] }
 0x182   : > { %1704 = vst [vmem:[%s2486_s24 + $0x718] sm:$0xff] %v1448_v48  ;;  %v1079_v39 = vmul.f32 %v4164_v55, %v567_v15  ;;  %v4165_v48 = vld [vmem:[#allocation96_spill] sm:$0xff]  ;;  %v1461_v56 = vadd.f32 %v2144_v28, %v1077_v21  ;;  %v2151_v6 = vld [vmem:[%s2447_s18 + $0x3b8] sm:$0xff]  ;;  %v579_v13 = vld [vmem:[%s2431_s19 + $0x7f0] sm:$0xff] }
 0x183   : > { %1705 = vst [vmem:[%s2486_s24 + $0x720] sm:$0xff] %v1449_v24  ;;  %v1080_v50 = vmul.f32 %v4165_v48, %v568_v1  ;;  %v4166_v24 = vld [vmem:[#allocation97_spill] sm:$0xff]  ;;  %v1462_v32 = vadd.f32 %v2145_v0, %v1078_v30  ;;  %v2152_v15 = vld [vmem:[%s2447_s18 + $0x3c0] sm:$0xff]  ;;  %v580_v20 = vld [vmem:[%s2431_s19 + $0x7f8] sm:$0xff] }
 0x184   : > { %1706 = vst [vmem:[%s2486_s24 + $0x728] sm:$0xff] %v1450_v31  ;;  %v1081_v29 = vmul.f32 %v4166_v24, %v569_v61  ;;  %v4167_v31 = vld [vmem:[#allocation98_spill] sm:$0xff]  ;;  %v1463_v10 = vadd.f32 %v2146_v35, %v1079_v39  ;;  %v2153_v21 = vld [vmem:[%s2447_s18 + $0x3c8] sm:$0xff]  ;;  %v1091_v61 = vmul.f32 %v3330_v5, %v579_v13  ;;  %v2156_v55 = vld [vmem:[%s2447_s18 + $0x3e0] sm:$0xff] }
 0x185   : > { %1707 = vst [vmem:[%s2486_s24 + $0x730] sm:$0xff] %v1451_v38  ;;  %v1082_v46 = vmul.f32 %v4167_v31, %v570_v57  ;;  %v4168_v38 = vld [vmem:[#allocation99_spill] sm:$0xff]  ;;  %v1464_v41 = vadd.f32 %v2147_v58, %v1080_v50  ;;  %v4174_v51 = vld [vmem:[#allocation105_spill] sm:$0xff]  ;;  %v2154_v19 = vld [vmem:[%s2447_s18 + $0x3d0] sm:$0xff] }
 0x186   : > { %1708 = vst [vmem:[%s2486_s24 + $0x738] sm:$0xff] %v1452_v33  ;;  %v1083_v22 = vmul.f32 %v4168_v38, %v571_v44  ;;  %v4169_v33 = vld [vmem:[#allocation100_spill] sm:$0xff]  ;;  %v1465_v43 = vadd.f32 %v2148_v27, %v1081_v29  ;;  %v2157_v57 = vld [vmem:[%s2447_s18 + $0x3e8] sm:$0xff]  ;;  %v2159_v5 = vld [vmem:[%s2447_s18 + $0x3f8] sm:$0xff] }
 0x187   : > { %1709 = vst [vmem:[%s2486_s24 + $0x740] sm:$0xff] %v1453_v25  ;;  %v1084_v45 = vmul.f32 %v4169_v33, %v572_v49  ;;  %v4170_v25 = vld [vmem:[#allocation101_spill] sm:$0xff]  ;;  %v1466_v3 = vadd.f32 %v2149_v54, %v1082_v46 }
 0x188   : > { %1710 = vst [vmem:[%s2486_s24 + $0x748] sm:$0xff] %v1454_v7  ;;  %v1085_v52 = vmul.f32 %v4170_v25, %v573_v11  ;;  %v4171_v7 = vld [vmem:[#allocation102_spill] sm:$0xff]  ;;  %v1467_v53 = vadd.f32 %v2150_v18, %v1083_v22 }
 0x189   : > { %1711 = vst [vmem:[%s2486_s24 + $0x750] sm:$0xff] %v1455_v62  ;;  %v1086_v60 = vmul.f32 %v4171_v7, %v574_v8  ;;  %v4172_v62 = vld [vmem:[#allocation103_spill] sm:$0xff]  ;;  %v1468_v42 = vadd.f32 %v2151_v6, %v1084_v45 }
 0x18a   : > { %1712 = vst [vmem:[%s2486_s24 + $0x758] sm:$0xff] %v1456_v26  ;;  %v1087_v14 = vmul.f32 %v4172_v62, %v575_v37  ;;  %v4173_v26 = vld [vmem:[#allocation104_spill] sm:$0xff]  ;;  %v1469_v40 = vadd.f32 %v2152_v15, %v1085_v52 }
 0x18b   : > { %1713 = vst [vmem:[%s2486_s24 + $0x760] sm:$0xff] %v1457_v12  ;;  %v1088_v59 = vmul.f32 %v4173_v26, %v576_v47  ;;  %v1089_v12 = vmul.f32 %v3316_v34, %v577_v63  ;;  %v1470_v1 = vadd.f32 %v2153_v21, %v1086_v60  ;;  %v2155_v34 = vld [vmem:[%s2447_s18 + $0x3d8] sm:$0xff] }
 0x18c   : > { %1714 = vst [vmem:[%s2486_s24 + $0x768] sm:$0xff] %v1458_v17  ;;  %v1090_v17 = vmul.f32 %v4174_v51, %v578_v4  ;;  %v1471_v30 = vadd.f32 %v2154_v19, %v1087_v14 }
 0x18d   : > { %1715 = vst [vmem:[%s2486_s24 + $0x770] sm:$0xff] %v1459_v9  ;;  %v1472_v2 = vadd.f32 %v2155_v34, %v1088_v59  ;;  %v1092_v9 = vmul.f32 %v3337_v36, %v580_v20  ;;  %v1473_v39 = vadd.f32 %v2156_v55, %v1089_v12 }
 0x18e   : > { %1716 = vst [vmem:[%s2486_s24 + $0x778] sm:$0xff] %v1460_v16  ;;  %v1474_v23 = vadd.f32 %v2157_v57, %v1090_v17  ;;  %v2158_v16 = vld [vmem:[%s2447_s18 + $0x3f0] sm:$0xff] }
 0x18f   : > { %1717 = vst [vmem:[%s2486_s24 + $0x780] sm:$0xff] %v1461_v56  ;;  %v1475_v48 = vadd.f32 %v2158_v16, %v1091_v61  ;;  %v1476_v50 = vadd.f32 %v2159_v5, %v1092_v9 }
 0x190   : > { %1718 = vst [vmem:[%s2486_s24 + $0x788] sm:$0xff] %v1462_v32 }
 0x191   : > { %1719 = vst [vmem:[%s2486_s24 + $0x790] sm:$0xff] %v1463_v10 }
 0x192   : > { %1720 = vst [vmem:[%s2486_s24 + $0x798] sm:$0xff] %v1464_v41 }
 0x193   : > { %1721 = vst [vmem:[%s2486_s24 + $0x7a0] sm:$0xff] %v1465_v43 }
 0x194   : > { %1722 = vst [vmem:[%s2486_s24 + $0x7a8] sm:$0xff] %v1466_v3 }
 0x195   : > { %1723 = vst [vmem:[%s2486_s24 + $0x7b0] sm:$0xff] %v1467_v53 }
 0x196   : > { %1724 = vst [vmem:[%s2486_s24 + $0x7b8] sm:$0xff] %v1468_v42 }
 0x197   : > { %1725 = vst [vmem:[%s2486_s24 + $0x7c0] sm:$0xff] %v1469_v40 }
 0x198   : > { %1726 = vst [vmem:[%s2486_s24 + $0x7c8] sm:$0xff] %v1470_v1 }
 0x199   : > { %1727 = vst [vmem:[%s2486_s24 + $0x7d0] sm:$0xff] %v1471_v30 }
 0x19a   : > { %1728 = vst [vmem:[%s2486_s24 + $0x7d8] sm:$0xff] %v1472_v2 }
 0x19b   : > { %1729 = vst [vmem:[%s2486_s24 + $0x7e0] sm:$0xff] %v1473_v39 }
 0x19c   : > { %1730 = vst [vmem:[%s2486_s24 + $0x7e8] sm:$0xff] %v1474_v23 }
 0x19d   : > { %1731 = vst [vmem:[%s2486_s24 + $0x7f0] sm:$0xff] %v1475_v48 }
 0x19e   : > { %1732 = vst [vmem:[%s2486_s24 + $0x7f8] sm:$0xff] %v1476_v50 }
 0x19f   : > { %s1942_s11 = sshll.u32 %s2266_s15, 10  ;;  %s1760_s4 = sshll.u32 %s2486_s24, 4  ;;  %s1761_s4 = int_to_ptr.vmem [resolvable:$true] %s1760_s4 }
 0x1a0   : > { %s1749_s8 = scalar_lea.hbm %s3905_s3, %s1942_s11  ;;  %s2284_s5 = smov 16384  }
 0x1a1   : > { %s1762_s10 = sshll.u32 %s1749_s8, 4  ;;  %1956 = sst [smem:[#allocation12]] (%p2366_p9), %s2284_s5  ;;  %s1763_s10 = int_to_ptr.hbm [resolvable:$true] %s1762_s10 }
 0x1a2   : > { %s2285_s7 = smov 32768   ;;  %s2286_s9 = smov 64  }
 0x1a3   : > { %1957 = sst [smem:[#allocation12 + $0x1]] (%p2366_p9), %s2285_s7  ;;  %s2287_s15 = smov 256  }
 0x1a4   : > { %1958 = sst [smem:[#allocation12 + $0x2]] (%p2366_p9), %s2286_s9  ;;  %s2288_s28 = smov 16  }
 0x1a5   : > { %1959 = sst [smem:[#allocation12 + $0x3]] (%p2366_p9), %s2287_s15  ;;  %s2289_s0 = smov [#allocation11]  }
 0x1a6   : > { %1960 = sst [smem:[#allocation12 + $0x4]] (%p2366_p9), %s2287_s15  ;;  %s2290_s20 = smov 0  }
 0x1a7   : > { %1961 = sst [smem:[#allocation12 + $0x5]] (%p2366_p9), %s2288_s28 }
 0x1a8   : > { %1962 = dma.general (%p2366_p9), %s1761_s4, 32768, %s1763_s10, %s1734_s23, %s2289_s0, [#allocation12], %s2290_s20, 0  }
 0x1a9 PF: > { %s1790_s29 = sand.u32 1, %s2254_s12   ;;  %p1965_p2 = pnand %p1909_p12, %p2373_p11 }
 0x1aa   : > { %s1791_s19 = scalar_lea.sflag [#allocation4], %s1790_s29 }
 0x1ab   : > { %p1966_p3 = pneg %p1965_p2 }
 0x1ad   : > { %2249 = dma.done.wait (%p1966_p3), %s1791_s19, 32768  }
 0x1ae   : > { %2251 = vsyncadd (%p1966_p3), %s1791_s19, 4294934528  ;;  %s22_s17 = sadd.s32 1, %s2274_s17   ;;  %s4175_s16 = sld [smem:[#allocation19_spill]] }
 0x1af   : > { %p19_p4 = scmp.ge.s32.totalorder %s22_s17, 4   ;;  %s4176_s15 = sld [smem:[#allocation17_spill]] }
 0x1b0   : > { %s4177_s25 = sld [smem:[#allocation18_spill]]  ;;  %s4178_s12 = smov %s2258_s13 }
 0x1b1   : > { %s4179_s13 = smov %s2262_s14 }
 0x1b2   :  { %21 = sbr.rel (!%p19_p4) target bundleno = 10 (0xa), region = 111 }
 0x1b4   : > { %s4180_s14 = smov %s4175_s16 }
 0x1b6   : > { %s4181_s16 = smov %s4177_s25 }
 0x1b7   :  { %1797 = vsyncpa [#allocation3], 1 }
 0x1b8   :  { %1799 = vsyncpa [#allocation3 + $0x1], 1 }
 0x1b9   :  { %1800 = vsyncpa [#allocation6], 1 }
 0x1ba   :  { %1802 = vsyncpa [#allocation6 + $0x1], 1 }
 0x1bb   :  { %1803 = vsyncpa [#allocation4], 1 }
 0x1bc   :  { %1805 = vsyncpa [#allocation4 + $0x1], 1 }

</bundles_post_ra>
